<compile_context>
chip_gen: v7x
topology: tpu7x:2x2x1
jax: 0.10.0
libtpu: 0.0.40
codegen_flags: <defaults>
</compile_context>

<pallas_src>
import jax
import jax.numpy as jnp
from jax.experimental import pallas as pl
from jax.experimental.pallas import tpu as pltpu

LANE = 128  # TPU vreg lane width


def _pad_to_multiple(x, axis, multiple):
    pad = (-x.shape[axis]) % multiple
    if pad == 0:
        return x
    widths = [(0, 0)] * x.ndim
    widths[axis] = (0, pad)
    return jnp.pad(x, widths)


def decoder_kernel(z_ref, w1_ref, b1_ref, w2_ref, b2_ref, w3_ref, b3_ref, out_ref):
    # fc1: Linear + ReLU  (Dropout == identity in eval mode)
    h = jnp.dot(z_ref[...], w1_ref[...], preferred_element_type=jnp.float32)
    h = jnp.maximum(h + b1_ref[...], 0.0)
    # fc2: Linear + ReLU  (Dropout == identity in eval mode)
    h = jnp.dot(h.astype(w2_ref.dtype), w2_ref[...], preferred_element_type=jnp.float32)
    h = jnp.maximum(h + b2_ref[...], 0.0)
    # fc3: Linear + sigmoid (kept in f32 for the elementwise/EUP path)
    logits = jnp.dot(h.astype(w3_ref.dtype), w3_ref[...], preferred_element_type=jnp.float32)
    logits = logits + b3_ref[...]
    out_ref[...] = jax.nn.sigmoid(logits).astype(out_ref.dtype)


def decoder_forward(z, params, *, tm=128, out_dtype=jnp.float32):
    """z: (B, z_dim) float32.  Returns (B, x_dim) `out_dtype` in [0, 1]."""
    w1, b1, w2, b2, w3, b3 = params
    B, z_dim = z.shape
    h_dim = w1.shape[1]
    x_dim = w3.shape[1]

    # ---- wrapper-side layout plumbing (padding + bf16 cast) ----------------
    # Pad all feature dims to multiples of 128 so matmuls / stores are
    # lane-dense; zero padding is exact (ReLU(0)=0 contributes nothing, padded
    # output columns are sliced off below).
    zp  = _pad_to_multiple(z.astype(jnp.bfloat16), 1, LANE)
    w1p = _pad_to_multiple(_pad_to_multiple(w1.astype(jnp.bfloat16), 0, LANE), 1, LANE)
    b1p = _pad_to_multiple(b1.astype(jnp.float32), 1, LANE)
    w2p = _pad_to_multiple(_pad_to_multiple(w2.astype(jnp.bfloat16), 0, LANE), 1, LANE)
    b2p = _pad_to_multiple(b2.astype(jnp.float32), 1, LANE)
    w3p = _pad_to_multiple(_pad_to_multiple(w3.astype(jnp.bfloat16), 0, LANE), 1, LANE)
    b3p = _pad_to_multiple(b3.astype(jnp.float32), 1, LANE)

    zk = zp.shape[1]   # padded z_dim
    hk = w1p.shape[1]  # padded h_dim
    xk = w3p.shape[1]  # padded x_dim

    # Batch tile: large enough to fill the MXU M dimension and amortize the
    # ~0.35 us per-grid-step overhead; never larger than the (8-aligned) batch.
    b_pad8 = B + ((-B) % 8)
    tm = max(8, min(tm, b_pad8))
    zp = _pad_to_multiple(zp, 0, tm)
    Bp = zp.shape[0]
    grid = (Bp // tm,)

    # Weights/biases use constant index maps, so Pallas keeps them VMEM-resident
    # and skips re-fetch DMAs between grid steps (~300 KB bf16 total).
    out_padded = pl.pallas_call(
        decoder_kernel,
        out_shape=jax.ShapeDtypeStruct((Bp, xk), out_dtype),
        grid_spec=pltpu.PrefetchScalarGridSpec(
            num_scalar_prefetch=0,
            grid=grid,
            in_specs=[
                pl.BlockSpec((tm, zk), lambda i: (i, 0)),    # z batch tile
                pl.BlockSpec((zk, hk), lambda i: (0, 0)),    # w1 (full, resident)
                pl.BlockSpec((1, hk),  lambda i: (0, 0)),    # b1
                pl.BlockSpec((hk, hk), lambda i: (0, 0)),    # w2 (full, resident)
                pl.BlockSpec((1, hk),  lambda i: (0, 0)),    # b2
                pl.BlockSpec((hk, xk), lambda i: (0, 0)),    # w3 (full, resident)
                pl.BlockSpec((1, xk),  lambda i: (0, 0)),    # b3
            ],
            out_specs=pl.BlockSpec((tm, xk), lambda i: (i, 0)),
        ),
        compiler_params=pltpu.CompilerParams(
            dimension_semantics=("parallel",),        # lets v7x split across 2 TCs
            vmem_limit_bytes=32 * 1024 * 1024,        # safe on v5e/v6e/v7x
        ),
    )(zp, w1p, b1p, w2p, b2p, w3p, b3p)

    return out_padded[:B, :x_dim]


def init_decoder_params(key, x_dim, h_dim, z_dim):
    """Deterministic synthetic params.  Weights stored as (in, out), f32."""
    k1, k2, k3, k4, k5, k6 = jax.random.split(key, 6)

    def uniform(k, shape, fan_in):
        bound = 1.0 / jnp.sqrt(fan_in)
        return jax.random.uniform(k, shape, jnp.float32, -bound, bound)

    w1 = uniform(k1, (z_dim, h_dim), z_dim)
    b1 = uniform(k2, (1, h_dim), z_dim)
    w2 = uniform(k3, (h_dim, h_dim), h_dim)
    b2 = uniform(k4, (1, h_dim), h_dim)
    w3 = uniform(k5, (h_dim, x_dim), h_dim)
    b3 = uniform(k6, (1, x_dim), h_dim)
    return (w1, b1, w2, b2, w3, b3)


def decoder_reference(z, params):
    w1, b1, w2, b2, w3, b3 = params
    h = jnp.maximum(z @ w1 + b1, 0.0)
    h = jnp.maximum(h @ w2 + b2, 0.0)
    return jax.nn.sigmoid(h @ w3 + b3)


if __name__ == "__main__":
    # MNIST-decoder-shaped: z(32) -> h(128) -> h(128) -> x(784); batch 256 so
    # the grid has 2 batch tiles of 128 (keeps both v7x TensorCores busy).
    B, z_dim, h_dim, x_dim = 256, 32, 128, 784

    key = jax.random.PRNGKey(0)
    kz, kp = jax.random.split(key)
    z = jax.random.normal(kz, (B, z_dim), jnp.float32)
    params = init_decoder_params(kp, x_dim, h_dim, z_dim)

    out = decoder_forward(z, params, tm=128)
    out = jax.block_until_ready(out)

    ref = decoder_reference(z, params)
    assert out.shape == (B, x_dim)
    # bf16 matmul operands (f32 accumulation) => loosen tolerance slightly.
    assert jnp.allclose(out, ref, atol=1e-2, rtol=1e-2), "mismatch vs reference"

    print("KERNEL_OK")
</pallas_src>

<mosaic_0001>
module attributes {stable_mosaic.version = 11 : i64} {
  func.func @decoder_kernel(%arg0: i32, %arg1: memref<128x128xbf16, #tpu.memory_space<vmem>>, %arg2: memref<128x128xbf16, #tpu.memory_space<vmem>>, %arg3: memref<1x128xf32, #tpu.memory_space<vmem>>, %arg4: memref<128x128xbf16, #tpu.memory_space<vmem>>, %arg5: memref<1x128xf32, #tpu.memory_space<vmem>>, %arg6: memref<128x896xbf16, #tpu.memory_space<vmem>>, %arg7: memref<1x896xf32, #tpu.memory_space<vmem>>, %arg8: memref<128x896xf32, #tpu.memory_space<vmem>>) attributes {dimension_semantics = [#tpu.dimension_semantics<parallel>], iteration_bounds = array<i64: 2>, scalar_prefetch = 0 : i64, scratch_operands = 0 : i64, tpu.core_type = #tpu.core_type<tc>, window_params = [{transform_indices = @transform_0, window_bounds = array<i64: 128, 128>}, {pipeline_mode = #tpu.pipeline_mode<synchronous>, transform_indices = @transform_1, window_bounds = array<i64: 128, 128>}, {pipeline_mode = #tpu.pipeline_mode<synchronous>, transform_indices = @transform_2, window_bounds = array<i64: 1, 128>}, {pipeline_mode = #tpu.pipeline_mode<synchronous>, transform_indices = @transform_3, window_bounds = array<i64: 128, 128>}, {pipeline_mode = #tpu.pipeline_mode<synchronous>, transform_indices = @transform_4, window_bounds = array<i64: 1, 128>}, {pipeline_mode = #tpu.pipeline_mode<synchronous>, transform_indices = @transform_5, window_bounds = array<i64: 128, 896>}, {pipeline_mode = #tpu.pipeline_mode<synchronous>, transform_indices = @transform_6, window_bounds = array<i64: 1, 896>}, {transform_indices = @transform_7, window_bounds = array<i64: 128, 896>}]} {
    %c0 = arith.constant 0 : index
    %c0_0 = arith.constant 0 : index
    %0 = vector.load %arg1[%c0, %c0_0] : memref<128x128xbf16, #tpu.memory_space<vmem>>, vector<128x128xbf16>
    %c0_1 = arith.constant 0 : index
    %c0_2 = arith.constant 0 : index
    %1 = vector.load %arg2[%c0_1, %c0_2] : memref<128x128xbf16, #tpu.memory_space<vmem>>, vector<128x128xbf16>
    %cst = arith.constant dense<0.000000e+00> : vector<128x128xf32>
    %2 = tpu.matmul %0, %1, %cst {dimension_numbers = #tpu.dot_dimension_numbers<[1], [0], [0], [1], [0, 0, 1, 1], [], []>} : vector<128x128xbf16>, vector<128x128xbf16>, vector<128x128xf32> -> vector<128x128xf32>
    %c0_3 = arith.constant 0 : index
    %c0_4 = arith.constant 0 : index
    %3 = vector.load %arg3[%c0_3, %c0_4] : memref<1x128xf32, #tpu.memory_space<vmem>>, vector<1x128xf32>
    %4 = vector.broadcast %3 : vector<1x128xf32> to vector<128x128xf32>
    %5 = arith.addf %2, %4 : vector<128x128xf32>
    %cst_5 = arith.constant 0.000000e+00 : f32
    %6 = vector.broadcast %cst_5 : f32 to vector<128x128xf32>
    %7 = arith.maximumf %5, %6 : vector<128x128xf32>
    %8 = arith.truncf %7 : vector<128x128xf32> to vector<128x128xbf16>
    %c0_6 = arith.constant 0 : index
    %c0_7 = arith.constant 0 : index
    %9 = vector.load %arg4[%c0_6, %c0_7] : memref<128x128xbf16, #tpu.memory_space<vmem>>, vector<128x128xbf16>
    %cst_8 = arith.constant dense<0.000000e+00> : vector<128x128xf32>
    %10 = tpu.matmul %8, %9, %cst_8 {dimension_numbers = #tpu.dot_dimension_numbers<[1], [0], [0], [1], [0, 0, 1, 1], [], []>} : vector<128x128xbf16>, vector<128x128xbf16>, vector<128x128xf32> -> vector<128x128xf32>
    %c0_9 = arith.constant 0 : index
    %c0_10 = arith.constant 0 : index
    %11 = vector.load %arg5[%c0_9, %c0_10] : memref<1x128xf32, #tpu.memory_space<vmem>>, vector<1x128xf32>
    %12 = vector.broadcast %11 : vector<1x128xf32> to vector<128x128xf32>
    %13 = arith.addf %10, %12 : vector<128x128xf32>
    %cst_11 = arith.constant 0.000000e+00 : f32
    %14 = vector.broadcast %cst_11 : f32 to vector<128x128xf32>
    %15 = arith.maximumf %13, %14 : vector<128x128xf32>
    %16 = arith.truncf %15 : vector<128x128xf32> to vector<128x128xbf16>
    %c0_12 = arith.constant 0 : index
    %c0_13 = arith.constant 0 : index
    %17 = vector.load %arg6[%c0_12, %c0_13] : memref<128x896xbf16, #tpu.memory_space<vmem>>, vector<128x896xbf16>
    %cst_14 = arith.constant dense<0.000000e+00> : vector<128x896xf32>
    %18 = tpu.matmul %16, %17, %cst_14 {dimension_numbers = #tpu.dot_dimension_numbers<[1], [0], [0], [1], [0, 0, 1, 1], [], []>} : vector<128x128xbf16>, vector<128x896xbf16>, vector<128x896xf32> -> vector<128x896xf32>
    %c0_15 = arith.constant 0 : index
    %c0_16 = arith.constant 0 : index
    %19 = vector.load %arg7[%c0_15, %c0_16] : memref<1x896xf32, #tpu.memory_space<vmem>>, vector<1x896xf32>
    %20 = vector.broadcast %19 : vector<1x896xf32> to vector<128x896xf32>
    %21 = arith.addf %18, %20 : vector<128x896xf32>
    %22 = arith.negf %21 : vector<128x896xf32>
    %23 = math.exp %22 : vector<128x896xf32>
    %cst_17 = arith.constant 1.000000e+00 : f32
    %24 = vector.broadcast %cst_17 : f32 to vector<128x896xf32>
    %25 = arith.addf %24, %23 : vector<128x896xf32>
    %26 = arith.divf %24, %25 : vector<128x896xf32>
    %c0_18 = arith.constant 0 : index
    %c0_19 = arith.constant 0 : index
    %27 = vector.load %arg8[%c0_18, %c0_19] : memref<128x896xf32, #tpu.memory_space<vmem>>, vector<128x896xf32>
    tpu.vector_store %arg8[%c0_18, %c0_19], %26 {strides = array<i32>} : memref<128x896xf32, #tpu.memory_space<vmem>>, vector<128x896xf32>,
    return
  }
  func.func @transform_0(%arg0: i32) -> (i32, i32) {
    %c0_i32 = arith.constant 0 : i32
    %c0_i32_0 = arith.constant 0 : i32
    return %arg0, %c0_i32 : i32, i32
  }
  func.func @transform_1(%arg0: i32) -> (i32, i32) {
    %c0_i32 = arith.constant 0 : i32
    %c0_i32_0 = arith.constant 0 : i32
    %c0_i32_1 = arith.constant 0 : i32
    return %c0_i32, %c0_i32_0 : i32, i32
  }
  func.func @transform_2(%arg0: i32) -> (i32, i32) {
    %c0_i32 = arith.constant 0 : i32
    %c0_i32_0 = arith.constant 0 : i32
    %c0_i32_1 = arith.constant 0 : i32
    return %c0_i32, %c0_i32_0 : i32, i32
  }
  func.func @transform_3(%arg0: i32) -> (i32, i32) {
    %c0_i32 = arith.constant 0 : i32
    %c0_i32_0 = arith.constant 0 : i32
    %c0_i32_1 = arith.constant 0 : i32
    return %c0_i32, %c0_i32_0 : i32, i32
  }
  func.func @transform_4(%arg0: i32) -> (i32, i32) {
    %c0_i32 = arith.constant 0 : i32
    %c0_i32_0 = arith.constant 0 : i32
    %c0_i32_1 = arith.constant 0 : i32
    return %c0_i32, %c0_i32_0 : i32, i32
  }
  func.func @transform_5(%arg0: i32) -> (i32, i32) {
    %c0_i32 = arith.constant 0 : i32
    %c0_i32_0 = arith.constant 0 : i32
    %c0_i32_1 = arith.constant 0 : i32
    return %c0_i32, %c0_i32_0 : i32, i32
  }
  func.func @transform_6(%arg0: i32) -> (i32, i32) {
    %c0_i32 = arith.constant 0 : i32
    %c0_i32_0 = arith.constant 0 : i32
    %c0_i32_1 = arith.constant 0 : i32
    return %c0_i32, %c0_i32_0 : i32, i32
  }
  func.func @transform_7(%arg0: i32) -> (i32, i32) {
    %c0_i32 = arith.constant 0 : i32
    %c0_i32_0 = arith.constant 0 : i32
    return %arg0, %c0_i32 : i32, i32
  }
}

</mosaic_0001>

<bundles_post_ra>
// kernel: tpu_custom_call.1
= control target key start
LH: loop header
LB: loop body
LE: loop exit
PB: predicated region body
PF: predicated region fallthrough
CT: control target
= control target key end

     0   :  { %12 = vsyncpa [#allocation3], 0  ;;  %s4677_s0 = inlined_call_operand.hbm [shape: bf16[256,128], index: 0, kind: input, shape index: {}]   ;;  %s4678_s1 = inlined_call_operand.hbm [shape: bf16[128,128], index: 1, kind: input, shape index: {}]   ;;  %s4679_s2 = inlined_call_operand.vmem [shape: f32[1,128], index: 2, kind: input, shape index: {}]   ;;  %s4680_s3 = inlined_call_operand.hbm [shape: bf16[128,128], index: 3, kind: input, shape index: {}]   ;;  %s4681_s4 = inlined_call_operand.vmem [shape: f32[1,128], index: 4, kind: input, shape index: {}]   ;;  %s4682_s5 = inlined_call_operand.hbm [shape: bf16[128,896], index: 5, kind: input, shape index: {}]   ;;  %s4683_s6 = inlined_call_operand.vmem [shape: f32[1,896], index: 6, kind: input, shape index: {}]   ;;  %s4684_s7 = inlined_call_operand.hbm [shape: f32[256,896], index: 7, kind: output, shape index: {}]  }
   0x1   :  { %14 = vsyncpa [#allocation3 + $0x1], 0 }
   0x2   :  { %15 = vsyncpa [#allocation6], 0 }
   0x3   :  { %16 = vsyncpa [#allocation9], 0 }
   0x4   :  { %17 = vsyncpa [#allocation4], 0 }
   0x5   :  { %19 = vsyncpa [#allocation4 + $0x1], 0  ;;  %s3757_s24 = smov 0   ;;  %s3759_s25 = smov 0  }
   0x6   :  { %s3761_s26 = smov 0   ;;  %s3763_s27 = smov 0  }
   0x7 LB: > { %s3778_s28 = sadd.s32 4294967295, %s3703_s27   ;;  %s2518_s29 = sadd.s32 4294967294, %s3703_s27   ;;  %s3703_s27 = sphi %s3763_s27, %s4714_s27   ;;  %s3699_s26 = sphi %s3761_s26, %s4713_s26   ;;  %s3695_s25 = sphi %s3759_s25, %s4712_s25   ;;  %s3691_s24 = sphi %s3757_s24, %s4711_s24  }
   0x8   : > { %p45_p0 = scmp.ne.s32.totalorder %s3695_s25, %s3691_s24  ;;  %p4685_p1 = scmp.eq.s32.totalorder %s3778_s28, 0 }
   0x9   : > { %p201_p3 = scmp.eq.s32.totalorder %s2518_s29, 1  ;;  %p2519_p5 = scmp.ge.s32.totalorder %s3703_s27, 1 }
   0xa   : > { %p3787_p4 = por %p4685_p1, %p45_p0  ;;  %p208_p7 = scmp.lt.s32.totalorder %s3703_s27, 3 }
   0xb   : > { %p3792_p6 = por %p201_p3, %p45_p0  ;;  %s3705_s10 = smov [#allocation5]  }
   0xc   : > { %s4689_s30 = scalar_select %p3787_p4, 1, 0 }
   0xd   : > { %s4690_s8 = scalar_select %p3792_p6, 1, 0 }
   0xe   : > { %p3797_p8 = pnand %p2519_p5, %p208_p7  ;;  %s220_s11 = sshll.u32 %s3705_s10, 4  ;;  %s3801_s11 = int_to_ptr.vmem [resolvable:$true] %s220_s11 }
   0xf   : > { %4691 = sst [smem:[#allocation15_spill]] %s4690_s8  ;;  %s3706_s13 = smov [#allocation7]  }
  0x10   : > { %s4692_s9 = scalar_select %p3797_p8, 1, 0 }
  0x11   : > { %p2894_p9 = pneg %p3797_p8  ;;  %s236_s14 = sshll.u32 %s3706_s13, 4  ;;  %s3812_s14 = int_to_ptr.vmem [resolvable:$true] %s236_s14 }
  0x12   : > { %s3707_s15 = smov [#allocation8]   ;;  %s3515_s19 = scalar_lea.hbm %s4678_s1, 1024 }
  0x13   : > { %p3808_p11 = pnand %p2894_p9, %p4685_p1  ;;  %s3814_s16 = sshll.u32 %s3707_s15, 4  ;;  %s253_s16 = int_to_ptr.vmem [resolvable:$true] %s3814_s16 }
  0x14   : > { %p3516_p12 = scmp.ne.s32.totalorder %s4678_s1, %s3515_s19  ;;  %p3522_p5 = scmp.lt.u32.totalorder %s3515_s19, %s4678_s1 }
  0x15   : > { %p3824_p13 = pneg %p3808_p11 }
  0x17   : > { %p3518_p0 = pnand %p3824_p13, %p3516_p12 }
  0x19   : > { %p3519_p3 = pneg %p3518_p0 }
  0x1b   : > { %p3524_p7 = pnand %p3522_p5, %p3519_p3 }
  0x1d   : > { %3527 = shalt.err (!%p3524_p7)
}
  0x1e   : > { %s3528_s10 = scalar_lea.vmem %s3801_s11, 1024  ;;  %p3536_p2 = scmp.lt.s32.totalorder %s3801_s11, %s3801_s11 }
  0x1f   : > { %p3529_p9 = scmp.ne.s32.totalorder %s3801_s11, %s3528_s10  ;;  %p3537_p6 = scmp.lt.s32.totalorder %s3528_s10, %s3528_s10 }
  0x21   : > { %p3531_p10 = pnand %p3529_p9, %p3824_p13  ;;  %p3538_p12 = por %p3537_p6, %p3536_p2 }
  0x23   : > { %p3532_p1 = pneg %p3531_p10 }
  0x25   : > { %p3539_p0 = pnand %p3538_p12, %p3532_p1 }
  0x27   : > { %3542 = shalt.err (!%p3539_p0)
}
  0x28   : > { %s3708_s13 = smov 64   ;;  %s3709_s15 = smov 4  }
  0x29   : > { %2897 = dma.hbm_to_vmem [thread:$0]  (!%p3808_p11), %s4678_s1, 1024, %s3801_s11, [#allocation6], %s3708_s13, %s3708_s13, %s3709_s15  }
  0x2a   : > { %s3543_s21 = scalar_lea.hbm %s4680_s3, 1024 }
  0x2b   : > { %p3544_p1 = scmp.ne.s32.totalorder %s4680_s3, %s3543_s21  ;;  %p3550_p10 = scmp.lt.u32.totalorder %s3543_s21, %s4680_s3 }
  0x2d   : > { %p3546_p2 = pnand %p3544_p1, %p3824_p13 }
  0x2f   : > { %p3547_p6 = pneg %p3546_p2 }
  0x31   : > { %p3552_p3 = pnand %p3550_p10, %p3547_p6 }
  0x33   : > { %3555 = shalt.err (!%p3552_p3)
}
  0x34   : > { %s3556_s11 = scalar_lea.vmem %s3812_s14, 1024  ;;  %p3564_p12 = scmp.lt.s32.totalorder %s3812_s14, %s3812_s14 }
  0x35   : > { %p3557_p5 = scmp.ne.s32.totalorder %s3812_s14, %s3556_s11  ;;  %p3565_p0 = scmp.lt.s32.totalorder %s3556_s11, %s3556_s11 }
  0x37   : > { %p3559_p7 = pnand %p3557_p5, %p3824_p13  ;;  %p3566_p1 = por %p3565_p0, %p3564_p12 }
  0x39   : > { %p3560_p9 = pneg %p3559_p7 }
  0x3b   : > { %p3567_p2 = pnand %p3566_p1, %p3560_p9 }
  0x3d   : > { %3570 = shalt.err (!%p3567_p2)
}
  0x3e   : > { %2900 = dma.hbm_to_vmem [thread:$0]  (!%p3808_p11), %s4680_s3, 1024, %s3812_s14, [#allocation6], %s3708_s13, %s3708_s13, %s3709_s15  }
  0x3f   : > { %s3571_s20 = scalar_lea.hbm %s4682_s5, 7168 }
  0x40   : > { %p3572_p6 = scmp.ne.s32.totalorder %s4682_s5, %s3571_s20  ;;  %p3578_p5 = scmp.lt.u32.totalorder %s3571_s20, %s4682_s5 }
  0x42   : > { %p3574_p10 = pnand %p3572_p6, %p3824_p13 }
  0x44   : > { %p3575_p3 = pneg %p3574_p10 }
  0x46   : > { %p3580_p7 = pnand %p3578_p5, %p3575_p3 }
  0x48   : > { %3583 = shalt.err (!%p3580_p7)
}
  0x49   : > { %s3584_s11 = scalar_lea.vmem %s253_s16, 7168  ;;  %p3592_p1 = scmp.lt.s32.totalorder %s253_s16, %s253_s16 }
  0x4a   : > { %p3585_p9 = scmp.ne.s32.totalorder %s253_s16, %s3584_s11  ;;  %p3593_p2 = scmp.lt.s32.totalorder %s3584_s11, %s3584_s11 }
  0x4c   : > { %p3587_p12 = pnand %p3585_p9, %p3824_p13  ;;  %p3594_p4 = por %p3593_p2, %p3592_p1 }
  0x4e   : > { %p3588_p0 = pneg %p3587_p12 }
  0x50   : > { %p3595_p8 = pnand %p3594_p4, %p3588_p0 }
  0x52   : > { %3598 = shalt.err (!%p3595_p8)
}
  0x53   : > { %s3710_s14 = smov 448   ;;  %s3711_s22 = smov 28  }
  0x54   : > { %2903 = dma.hbm_to_vmem [thread:$0]  (!%p3808_p11), %s4682_s5, 7168, %s253_s16, [#allocation9], %s3710_s14, %s3710_s14, %s3711_s22  }
  0x55   : > { %s3894_s18 = sadd.s32 1, %s3703_s27   ;;  %s32_s20 = sadd.s32 1, %s3699_s26 }
  0x56   : > { %s29_s19 = ssub.s32 %s3703_s27, %s3894_s18  ;;  %p39_p8 = scmp.ne.s32.totalorder %s3699_s26, %s3695_s25 }
  0x57   : > { %p30_p4 = scmp.eq.s32.totalorder %s29_s19, 0  ;;  %p40_p13 = scmp.eq.s32.totalorder %s3703_s27, 0 }
  0x58   : > { %p2915_p6 = scmp.lt.s32.totalorder %s3703_s27, 2  ;;  %p4695_p3 = scmp.eq.s32.totalorder %s3778_s28, 1 }
  0x59   : > { %s3904_s21 = scalar_select %p30_p4, %s3699_s26, %s32_s20  }
  0x5a   : > { %p41_p10 = por %p40_p13, %p39_p8  ;;  %p3908_p5 = por %p4695_p3, %p39_p8 }
  0x5b   : > { %s269_s12 = sand.u32 1, %s3699_s26   ;;  %s2731_s29 = sshll.u32 %s3703_s27, 10 }
  0x5c   : > { %s2524_s16 = sshll.u32 %s269_s12, 6  ;;  %s3917_s14 = scalar_lea.hbm %s4677_s0, %s2731_s29 }
  0x5d   : > { %s273_s22 = scalar_lea.vmem [#allocation2], %s2524_s16  ;;  %p3919_p11 = pnand %p2915_p6, %p41_p10 }
  0x5e   : > { %s280_s8 = sshll.u32 %s273_s22, 4  ;;  %s3925_s19 = scalar_lea.sflag [#allocation3], %s269_s12  ;;  %s3923_s8 = int_to_ptr.vmem [resolvable:$true] %s280_s8 }
  0x5f   : > { %s3599_s20 = scalar_lea.hbm %s3917_s14, 1024  ;;  %p3601_p9 = pneg %p3919_p11 }
  0x60   : > { %p3600_p7 = scmp.ne.s32.totalorder %s3917_s14, %s3599_s20  ;;  %s3604_s10 = scalar_lea.hbm %s4677_s0, 2048 }
  0x61   : > { %p3605_p1 = scmp.lt.u32.totalorder %s3917_s14, %s4677_s0  ;;  %p3606_p2 = scmp.lt.u32.totalorder %s3604_s10, %s3599_s20 }
  0x62   : > { %p3602_p12 = pnand %p3601_p9, %p3600_p7  ;;  %p3608_p8 = scmp.lt.u32.totalorder %s3599_s20, %s3917_s14 }
  0x63   : > { %p3607_p4 = por %p3606_p2, %p3605_p1 }
  0x64   : > { %p3603_p0 = pneg %p3602_p12 }
  0x65   : > { %p3609_p13 = por %p3608_p8, %p3607_p4 }
  0x67   : > { %p3610_p6 = pnand %p3609_p13, %p3603_p0 }
  0x69   : > { %3613 = shalt.err (!%p3610_p6)
}
  0x6a   : > { %s3614_s12 = scalar_lea.vmem %s3923_s8, 1024  ;;  %s3712_s29 = smov [#allocation2]  }
  0x6b   : > { %p3615_p10 = scmp.ne.s32.totalorder %s3923_s8, %s3614_s12  ;;  %s3619_s16 = sshll.u32 %s3712_s29, 4  ;;  %s3620_s16 = int_to_ptr.vmem [resolvable:$false] %s3619_s16 }
  0x6c   : > { %s3621_s11 = scalar_lea.vmem %s3620_s16, 2048  ;;  %p3622_p12 = scmp.lt.s32.totalorder %s3923_s8, %s3620_s16 }
  0x6d   : > { %p3617_p3 = pnand %p3615_p10, %p3601_p9  ;;  %p3623_p1 = scmp.lt.s32.totalorder %s3621_s11, %s3614_s12 }
  0x6f   : > { %p3618_p7 = pneg %p3617_p3  ;;  %p3624_p2 = por %p3623_p1, %p3622_p12 }
  0x71   : > { %p3625_p4 = pnand %p3624_p2, %p3618_p7 }
  0x73   : > { %3628 = shalt.err (!%p3625_p4)
}
  0x74   : > { %2907 = dma.hbm_to_vmem [thread:$0]  (!%p3919_p11), %s3917_s14, 1024, %s3923_s8, %s3925_s19, %s3708_s13, %s3708_s13, %s3709_s15  }
  0x75   : > { %p4698_p9 = scmp.ne.s32.totalorder %s4692_s9, 0 }
  0x77   : > { %292 = sbr.rel (%p4698_p9) target bundleno = 1086 (0x43e), region = 48 }
  0x7e   : > { %s3959_s20 = sand.u32 1, %s3695_s25   ;;  %p4699_p0 = scmp.ne.s32.totalorder %s4689_s30, 0 }
  0x7f   : > { %s2528_s10 = sshll.u32 %s3959_s20, 6  ;;  %s295_s22 = scalar_lea.sflag [#allocation3], %s3959_s20 }
  0x80   : > { %s3963_s12 = scalar_lea.vmem [#allocation2], %s2528_s10 }
  0x81   : > { %3674 = dma.done.wait (%p4699_p0), %s295_s22, 1024  }
  0x82   : > { %3676 = vsyncadd (%p4699_p0), %s295_s22, 4294966272  ;;  %p4700_p11 = scmp.eq.s32.totalorder %s3778_s28, 0 }
  0x84   : > { %3678 = dma.done.wait (%p4700_p11), [#allocation6], 2048   ;;  %p4701_p8 = pmov %p4700_p11 }
  0x86   : > { %3680 = vsyncadd (%p4701_p8), [#allocation6], 4294965248  ;;  %p4702_p13 = pmov %p4701_p8 }
  0x87   : > { %p4703_p6 = pmov %p4701_p8 }
  0x88   : > { %3682 = dma.done.wait (%p4702_p13), [#allocation9], 7168  }
  0x89   : > { %3684 = vsyncadd (%p4703_p6), [#allocation9], 4294960128  ;;  %v2962_v0 = vld [vmem:[#allocation5] sm:$0xff]   ;;  %v2963_v1 = vld [vmem:[#allocation5 + $0x8] sm:$0xff]   ;;  %s2876_s17 = smul.u32 896, %s3959_s20  ;;  %s3714_s13 = smov [#allocation10]  }
  0x8a   : > { %2780 = vmatprep.subr.bf16.mxu0 %v2962_v0  ;;  %v2964_v2 = vld [vmem:[#allocation5 + $0x10] sm:$0xff]   ;;  %v2965_v3 = vld [vmem:[#allocation5 + $0x18] sm:$0xff]   ;;  %v2970_v4 = vld [vmem:[%s3963_s12] sm:$0xff]   ;;  %s2877_s11 = smul.u32 14336, %s3778_s28  ;;  %s2402_s28 = scalar_lea.sflag [#allocation4], %s3959_s20 }
  0x8b   : > { %2781 = vmatpush3.bf16.msra.mxu0 %v2962_v0  ;;  %2796 = vmatprep.mubr.bf16.mxu0 %v2970_v4  ;;  %v2966_v5 = vld [vmem:[#allocation5 + $0x20] sm:$0xff]   ;;  %v2967_v6 = vld [vmem:[#allocation5 + $0x28] sm:$0xff]   ;;  %v2968_v9 = vld [vmem:[#allocation5 + $0x30] sm:$0xff]   ;;  %s4150_s19 = scalar_lea.vmem [#allocation10], %s2876_s17  ;;  %s3633_s15 = sshll.u32 %s3714_s13, 4  ;;  %s3634_s15 = int_to_ptr.vmem [resolvable:$false] %s3633_s15 }
  0x8c   : > { %2782 = vmatprep.subr.bf16.mxu0 %v2963_v1  ;;  %v2978_v7 = vld [vmem:[#allocation7] sm:$0xff]   ;;  %v2979_v8 = vld [vmem:[#allocation7 + $0x8] sm:$0xff]   ;;  %v2980_v10 = vld [vmem:[#allocation7 + $0x10] sm:$0xff]   ;;  %s2416_s10 = sshll.u32 %s4150_s19, 4  ;;  %s4628_s30 = scalar_lea.hbm %s4684_s7, %s2877_s11  ;;  %s4631_s10 = int_to_ptr.vmem [resolvable:$true] %s2416_s10 }
  0x8d   : > { %2812 = vmatprep.subr.bf16.mxu1 %v2978_v7  ;;  %v2969_v11 = vld [vmem:[#allocation5 + $0x38] sm:$0xff]   ;;  %v2982_v13 = vld [vmem:[#allocation7 + $0x20] sm:$0xff]   ;;  %v2971_v14 = vld [vmem:[%s3963_s12 + $0x8] sm:$0xff]   ;;  %s3629_s9 = scalar_lea.vmem %s4631_s10, 14336  ;;  %s3635_s14 = scalar_lea.vmem %s3634_s15, 28672 }
  0x8e   : > { %2813 = vmatpush3.bf16.msra.mxu1 %v2978_v7  ;;  %v2981_v12 = vld [vmem:[#allocation7 + $0x18] sm:$0xff]   ;;  %v2972_v15 = vld [vmem:[%s3963_s12 + $0x10] sm:$0xff]   ;;  %v2983_v16 = vld [vmem:[#allocation7 + $0x28] sm:$0xff]   ;;  %p3630_p10 = scmp.ne.s32.totalorder %s4631_s10, %s3629_s9  ;;  %p3636_p12 = scmp.lt.s32.totalorder %s4631_s10, %s3634_s15 }
  0x8f   : > { %2783 = vmatpush3.bf16.msra.mxu0 %v2963_v1  ;;  %2814 = vmatprep.subr.bf16.mxu1 %v2979_v8  ;;  %v2973_v17 = vld [vmem:[%s3963_s12 + $0x18] sm:$0xff]   ;;  %v2974_v18 = vld [vmem:[%s3963_s12 + $0x20] sm:$0xff]   ;;  %v2975_v19 = vld [vmem:[%s3963_s12 + $0x28] sm:$0xff]   ;;  %p3637_p1 = scmp.lt.s32.totalorder %s3635_s14, %s3629_s9 }
  0x90   : > { %2784 = vmatprep.subr.bf16.mxu0 %v2964_v2  ;;  %v2976_v20 = vld [vmem:[%s3963_s12 + $0x30] sm:$0xff]   ;;  %v2977_v21 = vld [vmem:[%s3963_s12 + $0x38] sm:$0xff]   ;;  %v2988_v25 = vld [vmem:[#allocation8 + $0x4] ss:$28 sps:$4 sm:$0xff]   ;;  %p3631_p3 = pnand %p3630_p10, %p3908_p5 }
  0x91   : > { %v2984_v22 = vld [vmem:[#allocation7 + $0x30] sm:$0xff]   ;;  %v2985_v23 = vld [vmem:[#allocation7 + $0x38] sm:$0xff]   ;;  %v2991_v26 = vld [vmem:[#allocation8 + $0xc] ss:$28 sps:$4 sm:$0xff]   ;;  %p3638_p2 = por %p3637_p1, %p3636_p12 }
  0x92   : > { %2815 = vmatpush3.bf16.msra.mxu1 %v2979_v8  ;;  %v2986_v24 = vld [vmem:[#allocation8] ss:$28 sps:$4 sm:$0xff]   ;;  %v2992_v28 = vld [vmem:[#allocation8 + $0x38] ss:$28 sps:$4 sm:$0xff]   ;;  %v2998_v30 = vld [vmem:[#allocation8 + $0x70] ss:$28 sps:$4 sm:$0xff]   ;;  %p3632_p7 = pneg %p3631_p3 }
  0x93   : > { %2785 = vmatpush3.bf16.msra.mxu0 %v2964_v2  ;;  %2816 = vmatprep.subr.bf16.mxu1 %v2980_v10  ;;  %v2994_v27 = vld [vmem:[#allocation8 + $0x3c] ss:$28 sps:$4 sm:$0xff]   ;;  %v3000_v29 = vld [vmem:[#allocation8 + $0x74] ss:$28 sps:$4 sm:$0xff]   ;;  %v3006_v31 = vld [vmem:[#allocation8 + $0xac] ss:$28 sps:$4 sm:$0xff]  }
  0x94   : > { %2786 = vmatprep.subr.bf16.mxu0 %v2965_v3  ;;  %v3004_v32 = vld [vmem:[#allocation8 + $0xa8] ss:$28 sps:$4 sm:$0xff]   ;;  %v3010_v34 = vld [vmem:[#allocation8 + $0xe0] ss:$28 sps:$4 sm:$0xff]   ;;  %v3016_v36 = vld [vmem:[#allocation8 + $0x118] ss:$28 sps:$4 sm:$0xff]   ;;  %p3639_p4 = pnand %p3638_p2, %p3632_p7 }
  0x95   : > { %v3012_v33 = vld [vmem:[#allocation8 + $0xe4] ss:$28 sps:$4 sm:$0xff]   ;;  %v3018_v35 = vld [vmem:[#allocation8 + $0x11c] ss:$28 sps:$4 sm:$0xff]  }
  0x96   : > { %2817 = vmatpush3.bf16.msra.mxu1 %v2980_v10  ;;  %v3988_v37 = vld [vmem:[%s4679_s2] ss:$0 sm:$0xff]  ;;  %v2989_v53 = vld [vmem:[#allocation8 + $0x8] ss:$28 sps:$4 sm:$0xff]   ;;  %v3003_v2 = vld [vmem:[#allocation8 + $0x7c] ss:$28 sps:$4 sm:$0xff]  }
  0x97   : > { %2787 = vmatpush3.bf16.msra.mxu0 %v2965_v3  ;;  %2818 = vmatprep.subr.bf16.mxu1 %v2981_v12  ;;  %v2997_v56 = vld [vmem:[#allocation8 + $0x44] ss:$28 sps:$4 sm:$0xff]   ;;  %v3001_v7 = vld [vmem:[#allocation8 + $0x78] ss:$28 sps:$4 sm:$0xff]  }
  0x98   : > { %2788 = vmatprep.subr.bf16.mxu0 %v2966_v5  ;;  %v2995_v0 = vld [vmem:[#allocation8 + $0x40] ss:$28 sps:$4 sm:$0xff]   ;;  %v3009_v10 = vld [vmem:[#allocation8 + $0xb4] ss:$28 sps:$4 sm:$0xff]  }
  0x9a   : > { %2819 = vmatpush3.bf16.msra.mxu1 %v2981_v12 }
  0x9b   : > { %2789 = vmatpush3.bf16.msra.mxu0 %v2966_v5  ;;  %2820 = vmatprep.subr.bf16.mxu1 %v2982_v13 }
  0x9c   : > { %2790 = vmatprep.subr.bf16.mxu0 %v2967_v6 }
  0x9e   : > { %2821 = vmatpush3.bf16.msra.mxu1 %v2982_v13 }
  0x9f   : > { %2791 = vmatpush3.bf16.msra.mxu0 %v2967_v6  ;;  %2822 = vmatprep.subr.bf16.mxu1 %v2983_v16 }
  0xa0   : > { %2792 = vmatprep.subr.bf16.mxu0 %v2968_v9 }
  0xa2   : > { %2823 = vmatpush3.bf16.msra.mxu1 %v2983_v16 }
  0xa3   : > { %2793 = vmatpush3.bf16.msra.mxu0 %v2968_v9  ;;  %2824 = vmatprep.subr.bf16.mxu1 %v2984_v22 }
  0xa4   : > { %2794 = vmatprep.subr.bf16.mxu0 %v2969_v11 }
  0xa6   : > { %2825 = vmatpush3.bf16.msra.mxu1 %v2984_v22 }
  0xa7   : > { %2795 = vmatpush3.bf16.msra.mxu0 %v2969_v11  ;;  %2826 = vmatprep.subr.bf16.mxu1 %v2985_v23 }
  0xa8   : > { %1181 = vmatprep.subr.bf16.mxu0 %v2988_v25  ;;  %v3013_v25 = vld [vmem:[#allocation8 + $0xe8] ss:$28 sps:$4 sm:$0xff]  }
  0xaa   : > { %2797 = vmatmul.mubr.bf16.vlgmr.msra.gmra.mrb[0].mxu0 %v2971_v14  ;;  %2827 = vmatpush3.bf16.msra.mxu1 %v2985_v23 }
  0xab   : > { %2800 = vmatprep.mubr.bf16.mxu0 %v2972_v15  ;;  %1182 = vmatpush1.bf16.msra.mxu0 %v2986_v24 }
  0xac   : > { %1294 = vmatprep.subr.bf16.mxu1 %v2991_v26  ;;  %1183 = vmatprep.subr.bf16.mxu0 %v2994_v27 }
  0xaf   : > { %1184 = vmatpush1.bf16.msra.mxu0 %v2992_v28  ;;  %v3021_v28 = vld [vmem:[#allocation8 + $0x124] ss:$28 sps:$4 sm:$0xff]  }
  0xb0   : > { %1185 = vmatprep.subr.bf16.mxu0 %v3000_v29 }
  0xb2   : > { %2801 = vmatmul.mubr.bf16.gmra.mrb[4].mxu0 %v2973_v17 }
  0xb3   : > { %2804 = vmatprep.mubr.bf16.mxu0 %v2974_v18  ;;  %1186 = vmatpush1.bf16.msra.mxu0 %v2998_v30  ;;  %v3007_v18 = vld [vmem:[#allocation8 + $0xb0] ss:$28 sps:$4 sm:$0xff]  }
  0xb4   : > { %1187 = vmatprep.subr.bf16.mxu0 %v3006_v31 }
  0xb7   : > { %1188 = vmatpush1.bf16.msra.mxu0 %v3004_v32 }
  0xb8   : > { %1189 = vmatprep.subr.bf16.mxu0 %v3012_v33 }
  0xba   : > { %2805 = vmatmul.mubr.bf16.gmra.mrb[8].mxu0 %v2975_v19 }
  0xbb   : > { %2808 = vmatprep.mubr.bf16.mxu0 %v2976_v20  ;;  %1190 = vmatpush1.bf16.msra.mxu0 %v3010_v34  ;;  %v3015_v20 = vld [vmem:[#allocation8 + $0xec] ss:$28 sps:$4 sm:$0xff]  }
  0xbc   : > { %1191 = vmatprep.subr.bf16.mxu0 %v3018_v35 }
  0xbf   : > { %1192 = vmatpush1.bf16.msra.mxu0 %v3016_v36  ;;  %v3019_v36 = vld [vmem:[#allocation8 + $0x120] ss:$28 sps:$4 sm:$0xff]  }
  0xc2   : > { %2809 = vmatmul.mubr.bf16.gmra.mrb[12].mxu0 %v2977_v21 }
 0x17d   : > { %v2798_v38 = vpop.f32.mrb[0].mxu0 }
 0x17e   : > { %v522_v39 = vadd.f32 %v2798_v38, %v3988_v37  ;;  %v513_v40 = vpop.f32.mrb[1].mxu0 }
 0x17f   : > { %v514_v41 = vadd.f32 %v3988_v37, %v513_v40  ;;  %v2799_v42 = vpop.f32.mrb[2].mxu0 }
 0x180   : > { %v525_v43 = vadd.f32 %v2799_v42, %v3988_v37  ;;  %v516_v44 = vpop.f32.mrb[3].mxu0  ;;  %v578_v46 = vmax.f32 %v522_v39, 0.0  ;;  %v3024_v42 = vld [vmem:[#allocation8 + $0x154] ss:$28 sps:$4 sm:$0xff]  }
 0x181   : > { %v517_v45 = vadd.f32 %v3988_v37, %v516_v44  ;;  %v576_v48 = vmax.f32 %v514_v41, 0.0  ;;  %v3022_v44 = vld [vmem:[#allocation8 + $0x150] ss:$28 sps:$4 sm:$0xff]   ;;  %1193 = vmatprep.subr.bf16.mxu0 %v3024_v42 }
 0x182   : > { %v579_v47 = vmax.f32 %v525_v43, 0.0  ;;  %v3027_v43 = vld [vmem:[#allocation8 + $0x15c] ss:$28 sps:$4 sm:$0xff]   ;;  %1194 = vmatpush1.bf16.msra.mxu0 %v3022_v44  ;;  %v3046_v44 = vld [vmem:[#allocation8 + $0xf0] ss:$28 sps:$4 sm:$0xff]  }
 0x183   : > { %v577_v49 = vmax.f32 %v517_v45, 0.0  ;;  %v3025_v45 = vld [vmem:[#allocation8 + $0x158] ss:$28 sps:$4 sm:$0xff]  }
 0x184   : > { %v593_v50 = vpack.c.bf16 %v579_v47, %v578_v46  ;;  %v3030_v46 = vld [vmem:[#allocation8 + $0x18c] ss:$28 sps:$4 sm:$0xff]  }
 0x185   : > { %v2802_v51 = vpop.f32.mrb[4].mxu0  ;;  %v592_v52 = vpack.c.bf16 %v577_v49, %v576_v48  ;;  %v3028_v47 = vld [vmem:[#allocation8 + $0x188] ss:$28 sps:$4 sm:$0xff]   ;;  %v3031_v48 = vld [vmem:[#allocation8 + $0x190] ss:$28 sps:$4 sm:$0xff]   ;;  %1195 = vmatprep.subr.bf16.mxu0 %v3030_v46  ;;  %v3713_v49 = vmov 0  }
 0x186   : > { %v538_v54 = vadd.f32 %v2802_v51, %v3988_v37  ;;  %v529_v55 = vpop.f32.mrb[5].mxu0  ;;  %1196 = vmatpush1.bf16.msra.mxu0 %v3028_v47  ;;  %1213 = vmatprep.mubr.bf16.mxu0 %v3713_v49  ;;  %v3049_v51 = vld [vmem:[#allocation8 + $0x18] ss:$28 sps:$4 sm:$0xff]   ;;  %v3053_v47 = vld [vmem:[#allocation8 + $0x12c] ss:$28 sps:$4 sm:$0xff]  }
 0x187   : > { %v530_v57 = vadd.f32 %v3988_v37, %v529_v55  ;;  %2828 = vmatprep.mubr.bf16.mxu1 %v592_v52  ;;  %v2803_v58 = vpop.f32.mrb[6].mxu0  ;;  %v4011_v52 = vld [vmem:[%s4681_s4] ss:$0 sm:$0xff] }
 0x188   : > { %v582_v59 = vmax.f32 %v538_v54, 0.0  ;;  %v541_v60 = vadd.f32 %v2803_v58, %v3988_v37  ;;  %2829 = vmatmul.mubr.bf16.vlgmr.msra.gmra.mrb[0].mxu1 %v593_v50  ;;  %v532_v61 = vpop.f32.mrb[7].mxu0  ;;  %v3036_v50 = vld [vmem:[#allocation8 + $0x14] ss:$28 sps:$4 sm:$0xff]  }
 0x189   : > { %v580_v62 = vmax.f32 %v530_v57, 0.0  ;;  %v533_v63 = vadd.f32 %v3988_v37, %v532_v61  ;;  %1295 = vmatpush1.bf16.msra.mxu1 %v2989_v53  ;;  %1407 = vmatprep.subr.bf16.mxu0 %v3036_v50 }
 0x18a   : > { %v583_v1 = vmax.f32 %v541_v60, 0.0  ;;  %1296 = vmatprep.subr.bf16.mxu1 %v2997_v56 }
 0x18b   : > { %v581_v3 = vmax.f32 %v533_v63, 0.0 }
 0x18c   : > { %v595_v4 = vpack.c.bf16 %v583_v1, %v582_v59 }
 0x18d   : > { %v594_v5 = vpack.c.bf16 %v581_v3, %v580_v62  ;;  %v2806_v6 = vpop.f32.mrb[8].mxu0  ;;  %1297 = vmatpush1.bf16.msra.mxu1 %v2995_v0 }
 0x18e   : > { %v554_v8 = vadd.f32 %v2806_v6, %v3988_v37  ;;  %v545_v9 = vpop.f32.mrb[9].mxu0  ;;  %1298 = vmatprep.subr.bf16.mxu1 %v3003_v2  ;;  %v3034_v2 = vld [vmem:[#allocation8 + $0x10] ss:$28 sps:$4 sm:$0xff]  }
 0x18f   : > { %2832 = vmatprep.mubr.bf16.mxu1 %v594_v5  ;;  %v546_v11 = vadd.f32 %v3988_v37, %v545_v9  ;;  %v2807_v12 = vpop.f32.mrb[10].mxu0  ;;  %v3039_v5 = vld [vmem:[#allocation8 + $0x4c] ss:$28 sps:$4 sm:$0xff]  }
 0x190   : > { %2833 = vmatmul.mubr.bf16.gmra.mrb[4].mxu1 %v595_v4  ;;  %v586_v13 = vmax.f32 %v554_v8, 0.0  ;;  %v557_v14 = vadd.f32 %v2807_v12, %v3988_v37  ;;  %v548_v15 = vpop.f32.mrb[11].mxu0 }
 0x191   : > { %v584_v16 = vmax.f32 %v546_v11, 0.0  ;;  %v549_v17 = vadd.f32 %v3988_v37, %v548_v15  ;;  %1299 = vmatpush1.bf16.msra.mxu1 %v3001_v7 }
 0x192   : > { %v587_v19 = vmax.f32 %v557_v14, 0.0  ;;  %1300 = vmatprep.subr.bf16.mxu1 %v3009_v10  ;;  %v3050_v10 = vld [vmem:[#allocation8 + $0x50] ss:$28 sps:$4 sm:$0xff]   ;;  %v3037_v14 = vld [vmem:[#allocation8 + $0x48] ss:$28 sps:$4 sm:$0xff]  }
 0x193   : > { %v585_v21 = vmax.f32 %v549_v17, 0.0  ;;  %v3042_v17 = vld [vmem:[#allocation8 + $0x84] ss:$28 sps:$4 sm:$0xff]  }
 0x194   : > { %v597_v22 = vpack.c.bf16 %v587_v19, %v586_v13 }
 0x195   : > { %v596_v23 = vpack.c.bf16 %v585_v21, %v584_v16  ;;  %v2810_v24 = vpop.f32.mrb[12].mxu0  ;;  %1301 = vmatpush1.bf16.msra.mxu1 %v3007_v18 }
 0x196   : > { %v570_v26 = vadd.f32 %v2810_v24, %v3988_v37  ;;  %v561_v27 = vpop.f32.mrb[13].mxu0  ;;  %1302 = vmatprep.subr.bf16.mxu1 %v3015_v20  ;;  %v3054_v24 = vld [vmem:[#allocation8 + $0x88] ss:$28 sps:$4 sm:$0xff]  }
 0x197   : > { %2836 = vmatprep.mubr.bf16.mxu1 %v596_v23  ;;  %v562_v29 = vadd.f32 %v3988_v37, %v561_v27  ;;  %v2811_v30 = vpop.f32.mrb[14].mxu0  ;;  %v3040_v23 = vld [vmem:[#allocation8 + $0x80] ss:$28 sps:$4 sm:$0xff]  }
 0x198   : > { %2837 = vmatmul.mubr.bf16.gmra.mrb[8].mxu1 %v597_v22  ;;  %v590_v31 = vmax.f32 %v570_v26, 0.0  ;;  %v573_v32 = vadd.f32 %v2811_v30, %v3988_v37  ;;  %v564_v33 = vpop.f32.mrb[15].mxu0  ;;  %v3045_v27 = vld [vmem:[#allocation8 + $0xbc] ss:$28 sps:$4 sm:$0xff]  }
 0x199   : > { %v588_v34 = vmax.f32 %v562_v29, 0.0  ;;  %v565_v35 = vadd.f32 %v3988_v37, %v564_v33  ;;  %1303 = vmatpush1.bf16.msra.mxu1 %v3013_v25  ;;  %v3033_v37 = vld [vmem:[#allocation8 + $0x194] ss:$28 sps:$4 sm:$0xff]   ;;  %v3055_v30 = vld [vmem:[#allocation8 + $0xc0] ss:$28 sps:$4 sm:$0xff]  }
 0x19a   : > { %v591_v38 = vmax.f32 %v573_v32, 0.0  ;;  %1304 = vmatprep.subr.bf16.mxu1 %v3021_v28 }
 0x19b   : > { %v589_v39 = vmax.f32 %v565_v35, 0.0 }
 0x19c   : > { %v599_v40 = vpack.c.bf16 %v591_v38, %v590_v31 }
 0x19d   : > { %v598_v41 = vpack.c.bf16 %v589_v39, %v588_v34  ;;  %1305 = vmatpush1.bf16.msra.mxu1 %v3019_v36  ;;  %v3043_v36 = vld [vmem:[#allocation8 + $0xb8] ss:$28 sps:$4 sm:$0xff]  }
 0x19e   : > { %1306 = vmatprep.subr.bf16.mxu1 %v3027_v43  ;;  %v3048_v39 = vld [vmem:[#allocation8 + $0xf4] ss:$28 sps:$4 sm:$0xff]  }
 0x19f   : > { %2840 = vmatprep.mubr.bf16.mxu1 %v598_v41 }
 0x1a0   : > { %2841 = vmatmul.mubr.bf16.gmra.mrb[12].mxu1 %v599_v40 }
 0x1a1   : > { %1307 = vmatpush1.bf16.msra.mxu1 %v3025_v45  ;;  %1326 = vmatprep.mubr.bf16.mxu1 %v3713_v49  ;;  %v3059_v45 = vld [vmem:[#allocation8 + $0xf8] ss:$28 sps:$4 sm:$0xff]  }
 0x1a2   : > { %1308 = vmatprep.subr.bf16.mxu1 %v3033_v37 }
 0x1a5   : > { %1309 = vmatpush1.bf16.msra.mxu1 %v3031_v48 }
 0x1a6   : > { %2844 = vmatprep.subr.bf16.mxu1 %v3049_v51 }
 0x25b   : > { %v2830_v53 = vpop.f32.mrb[0].mxu1 }
 0x25c   : > { %v714_v54 = vadd.f32 %v2830_v53, %v4011_v52  ;;  %v705_v55 = vpop.f32.mrb[1].mxu1 }
 0x25d   : > { %v706_v56 = vadd.f32 %v4011_v52, %v705_v55  ;;  %v2831_v57 = vpop.f32.mrb[2].mxu1 }
 0x25e   : > { %v717_v58 = vadd.f32 %v2831_v57, %v4011_v52  ;;  %v708_v59 = vpop.f32.mrb[3].mxu1  ;;  %v770_v61 = vmax.f32 %v714_v54, 0.0 }
 0x25f   : > { %v709_v60 = vadd.f32 %v4011_v52, %v708_v59  ;;  %v768_v63 = vmax.f32 %v706_v56, 0.0 }
 0x260   : > { %v771_v62 = vmax.f32 %v717_v58, 0.0  ;;  %v3051_v58 = vld [vmem:[#allocation8 + $0x128] ss:$28 sps:$4 sm:$0xff]  }
 0x261   : > { %v769_v0 = vmax.f32 %v709_v60, 0.0  ;;  %v3058_v60 = vld [vmem:[#allocation8 + $0x164] ss:$28 sps:$4 sm:$0xff]  }
 0x262   : > { %v4017_v1 = vpack.c.bf16 %v771_v62, %v770_v61 }
 0x263   : > { %v4019_v3 = vpack.c.bf16 %v769_v0, %v768_v63  ;;  %v2834_v4 = vpop.f32.mrb[4].mxu1  ;;  %v3056_v0 = vld [vmem:[#allocation8 + $0x160] ss:$28 sps:$4 sm:$0xff]  }
 0x264   : > { %v730_v6 = vadd.f32 %v2834_v4, %v4011_v52  ;;  %v721_v7 = vpop.f32.mrb[5].mxu1  ;;  %v3063_v4 = vld [vmem:[#allocation8 + $0x19c] ss:$28 sps:$4 sm:$0xff]  }
 0x265   : > { %v722_v8 = vadd.f32 %v4011_v52, %v721_v7  ;;  %1214 = vmatmul.mubr.bf16.vlgmr.msra.gmra.mrb[16].mxu0 %v4019_v3  ;;  %1327 = vmatmul.mubr.bf16.vlgmr.msra.gmra.mrb[16].mxu1 %v4019_v3  ;;  %v2835_v9 = vpop.f32.mrb[6].mxu1 }
 0x266   : > { %v774_v11 = vmax.f32 %v730_v6, 0.0  ;;  %1408 = vmatpush1.bf16.msra.mxu0 %v3034_v2  ;;  %v733_v12 = vadd.f32 %v2835_v9, %v4011_v52  ;;  %v724_v13 = vpop.f32.mrb[7].mxu1  ;;  %1223 = vmatprep.mubr.bf16.mxu0 %v3713_v49  ;;  %v3064_v2 = vld [vmem:[#allocation8 + $0x168] ss:$28 sps:$4 sm:$0xff]  }
 0x267   : > { %v772_v15 = vmax.f32 %v722_v8, 0.0  ;;  %v725_v16 = vadd.f32 %v4011_v52, %v724_v13  ;;  %1336 = vmatprep.mubr.bf16.mxu1 %v3713_v49  ;;  %1409 = vmatprep.subr.bf16.mxu0 %v3039_v5  ;;  %v3061_v5 = vld [vmem:[#allocation8 + $0x198] ss:$28 sps:$4 sm:$0xff]   ;;  %v4094_v8 = vld [vmem:[%s4683_s6] sm:$0xff] }
 0x268   : > { %v775_v18 = vmax.f32 %v733_v12, 0.0  ;;  %2845 = vmatpush3.bf16.msra.mxu1 %v3049_v51  ;;  %v3060_v51 = vld [vmem:[#allocation8 + $0x130] ss:$28 sps:$4 sm:$0xff]  }
 0x269   : > { %v773_v19 = vmax.f32 %v725_v16, 0.0  ;;  %2846 = vmatprep.subr.bf16.mxu1 %v3050_v10 }
 0x26a   : > { %v4029_v20 = vpack.c.bf16 %v775_v18, %v774_v11  ;;  %1410 = vmatpush1.bf16.msra.mxu0 %v3037_v14 }
 0x26b   : > { %v4031_v21 = vpack.c.bf16 %v773_v19, %v772_v15  ;;  %v2838_v22 = vpop.f32.mrb[8].mxu1  ;;  %1411 = vmatprep.subr.bf16.mxu0 %v3042_v17 }
 0x26c   : > { %v746_v25 = vadd.f32 %v2838_v22, %v4011_v52  ;;  %v737_v26 = vpop.f32.mrb[9].mxu1  ;;  %2847 = vmatpush3.bf16.msra.mxu1 %v3050_v10 }
 0x26d   : > { %1224 = vmatmul.mubr.bf16.gmra.mrb[20].mxu0 %v4017_v1  ;;  %1337 = vmatmul.mubr.bf16.gmra.mrb[20].mxu1 %v4017_v1  ;;  %v738_v28 = vadd.f32 %v4011_v52, %v737_v26  ;;  %v2839_v29 = vpop.f32.mrb[10].mxu1 }
 0x26e   : > { %v778_v31 = vmax.f32 %v746_v25, 0.0  ;;  %1233 = vmatprep.mubr.bf16.mxu0 %v3713_v49  ;;  %1346 = vmatprep.mubr.bf16.mxu1 %v3713_v49  ;;  %v749_v32 = vadd.f32 %v2839_v29, %v4011_v52  ;;  %v740_v33 = vpop.f32.mrb[11].mxu1 }
 0x26f   : > { %v776_v34 = vmax.f32 %v738_v28, 0.0  ;;  %1412 = vmatpush1.bf16.msra.mxu0 %v3040_v23  ;;  %v741_v35 = vadd.f32 %v4011_v52, %v740_v33  ;;  %2848 = vmatprep.subr.bf16.mxu1 %v3054_v24 }
 0x270   : > { %v779_v38 = vmax.f32 %v749_v32, 0.0  ;;  %1413 = vmatprep.subr.bf16.mxu0 %v3045_v27  ;;  %2849 = vmatpush3.bf16.msra.mxu1 %v3054_v24 }
 0x271   : > { %v777_v40 = vmax.f32 %v741_v35, 0.0  ;;  %2850 = vmatprep.subr.bf16.mxu1 %v3055_v30 }
 0x272   : > { %v4041_v41 = vpack.c.bf16 %v779_v38, %v778_v31 }
 0x273   : > { %v4043_v42 = vpack.c.bf16 %v777_v40, %v776_v34  ;;  %1414 = vmatpush1.bf16.msra.mxu0 %v3043_v36  ;;  %v2842_v43 = vpop.f32.mrb[12].mxu1 }
 0x274   : > { %v762_v46 = vadd.f32 %v2842_v43, %v4011_v52  ;;  %1415 = vmatprep.subr.bf16.mxu0 %v3048_v39  ;;  %v753_v37 = vpop.f32.mrb[13].mxu1  ;;  %2851 = vmatpush3.bf16.msra.mxu1 %v3055_v30 }
 0x275   : > { %1234 = vmatmul.mubr.bf16.gmra.mrb[24].mxu0 %v4031_v21  ;;  %1347 = vmatmul.mubr.bf16.gmra.mrb[24].mxu1 %v4031_v21  ;;  %v754_v48 = vadd.f32 %v4011_v52, %v753_v37  ;;  %v2843_v50 = vpop.f32.mrb[14].mxu1 }
 0x276   : > { %1243 = vmatprep.mubr.bf16.mxu0 %v3713_v49  ;;  %1356 = vmatprep.mubr.bf16.mxu1 %v3713_v49  ;;  %v782_v53 = vmax.f32 %v762_v46, 0.0  ;;  %v765_v54 = vadd.f32 %v2843_v50, %v4011_v52  ;;  %v756_v55 = vpop.f32.mrb[15].mxu1 }
 0x277   : > { %v780_v56 = vmax.f32 %v754_v48, 0.0  ;;  %1416 = vmatpush1.bf16.msra.mxu0 %v3046_v44  ;;  %v757_v57 = vadd.f32 %v4011_v52, %v756_v55  ;;  %2852 = vmatprep.subr.bf16.mxu1 %v3059_v45  ;;  %v3065_v52 = vld [vmem:[#allocation8 + $0x1a0] ss:$28 sps:$4 sm:$0xff]  }
 0x278   : > { %v783_v59 = vmax.f32 %v765_v54, 0.0  ;;  %1417 = vmatprep.subr.bf16.mxu0 %v3053_v47  ;;  %2853 = vmatpush3.bf16.msra.mxu1 %v3059_v45 }
 0x279   : > { %v781_v61 = vmax.f32 %v757_v57, 0.0  ;;  %2854 = vmatprep.subr.bf16.mxu1 %v3060_v51 }
 0x27a   : > { %v791_v62 = vpack.c.bf16 %v783_v59, %v782_v53 }
 0x27b   : > { %v790_v63 = vpack.c.bf16 %v781_v61, %v780_v56  ;;  %1418 = vmatpush1.bf16.msra.mxu0 %v3051_v58 }
 0x27c   : > { %1419 = vmatprep.subr.bf16.mxu0 %v3058_v60  ;;  %2855 = vmatpush3.bf16.msra.mxu1 %v3060_v51 }
 0x27d   : > { %1244 = vmatmul.mubr.bf16.gmra.mrb[28].mxu0 %v4029_v20  ;;  %1357 = vmatmul.mubr.bf16.gmra.mrb[28].mxu1 %v4029_v20 }
 0x27e   : > { %1253 = vmatprep.mubr.bf16.mxu0 %v3713_v49  ;;  %1366 = vmatprep.mubr.bf16.mxu1 %v3713_v49 }
 0x27f   : > { %1420 = vmatpush1.bf16.msra.mxu0 %v3056_v0  ;;  %2856 = vmatprep.subr.bf16.mxu1 %v3064_v2 }
 0x280   : > { %1421 = vmatprep.subr.bf16.mxu0 %v3063_v4  ;;  %2857 = vmatpush3.bf16.msra.mxu1 %v3064_v2 }
 0x281   : > { %2858 = vmatprep.subr.bf16.mxu1 %v3065_v52 }
 0x283   : > { %1422 = vmatpush1.bf16.msra.mxu0 %v3061_v5 }
 0x284   : > { %2859 = vmatpush3.bf16.msra.mxu1 %v3065_v52 }
 0x285   : > { %1254 = vmatmul.mubr.bf16.gmra.mrb[32].mxu0 %v4043_v42  ;;  %1367 = vmatmul.mubr.bf16.gmra.mrb[32].mxu1 %v4043_v42 }
 0x286   : > { %1263 = vmatprep.mubr.bf16.mxu0 %v3713_v49  ;;  %1376 = vmatprep.mubr.bf16.mxu1 %v3713_v49 }
 0x28d   : > { %1264 = vmatmul.mubr.bf16.gmra.mrb[36].mxu0 %v4041_v41  ;;  %1377 = vmatmul.mubr.bf16.gmra.mrb[36].mxu1 %v4041_v41 }
 0x28e   : > { %1273 = vmatprep.mubr.bf16.mxu0 %v3713_v49  ;;  %1386 = vmatprep.mubr.bf16.mxu1 %v3713_v49 }
 0x295   : > { %1274 = vmatmul.mubr.bf16.gmra.mrb[40].mxu0 %v790_v63  ;;  %1387 = vmatmul.mubr.bf16.gmra.mrb[40].mxu1 %v790_v63 }
 0x296   : > { %1283 = vmatprep.mubr.bf16.mxu0 %v3713_v49  ;;  %1396 = vmatprep.mubr.bf16.mxu1 %v3713_v49 }
 0x29d   : > { %1284 = vmatmul.mubr.bf16.gmra.mrb[44].mxu0 %v791_v62  ;;  %1397 = vmatmul.mubr.bf16.gmra.mrb[44].mxu1 %v791_v62 }
 0x29e   : > { %2860 = vmatprep.mubr.bf16.mxu1 %v4019_v3  ;;  %1439 = vmatprep.mubr.bf16.mxu0 %v3713_v49 }
 0x2a5   : > { %1440 = vmatmul.mubr.bf16.vlgmr.msra.gmra.mrb[48].mxu0 %v4019_v3  ;;  %2861 = vmatmul.mubr.bf16.vlgmr.msra.gmra.mrb[48].mxu1 %v4017_v1 }
 0x2a6   : > { %2864 = vmatprep.mubr.bf16.mxu1 %v4031_v21  ;;  %1449 = vmatprep.mubr.bf16.mxu0 %v3713_v49 }
 0x2ad   : > { %1450 = vmatmul.mubr.bf16.gmra.mrb[52].mxu0 %v4017_v1  ;;  %2865 = vmatmul.mubr.bf16.gmra.mrb[52].mxu1 %v4029_v20  ;;  %v858_v1 = vlaneseq }
 0x2ae   : > { %2868 = vmatprep.mubr.bf16.mxu1 %v4043_v42  ;;  %1459 = vmatprep.mubr.bf16.mxu0 %v3713_v49 }
 0x2af   : > { %v4087_v3 = vshrl.u32 %v858_v1, 7 }
 0x2b1   : > { %v860_v6 = vsub.s32 0, %v4087_v3  ;;  %v868_v7 = vsub.s32 2, %v4087_v3  ;;  %v864_v9 = vsub.s32 1, %v4087_v3  ;;  %v872_v10 = vsub.s32 3, %v4087_v3 }
 0x2b3   : > { %v4099_v11 = vrot.slane %v4094_v8, %v860_v6  ;;  %v4105_v12 = vrot.slane %v4094_v8, %v864_v9  ;;  %v4108_v13 = vrot.slane %v4094_v8, %v872_v10 }
 0x2b5   : > { %1460 = vmatmul.mubr.bf16.gmra.mrb[56].mxu0 %v4031_v21  ;;  %2869 = vmatmul.mubr.bf16.gmra.mrb[56].mxu1 %v4041_v41 }
 0x2b6   : > { %2872 = vmatprep.mubr.bf16.mxu1 %v790_v63  ;;  %1469 = vmatprep.mubr.bf16.mxu0 %v3713_v49 }
 0x2bd   : > { %1470 = vmatmul.mubr.bf16.gmra.mrb[60].mxu0 %v4029_v20  ;;  %2873 = vmatmul.mubr.bf16.gmra.mrb[60].mxu1 %v791_v62 }
 0x2be   : > { %1479 = vmatprep.mubr.bf16.mxu0 %v3713_v49 }
 0x2c5   : > { %1480 = vmatmul.mubr.bf16.gmra.mrb[64].mxu0 %v4043_v42 }
 0x2c6   : > { %1489 = vmatprep.mubr.bf16.mxu0 %v3713_v49 }
 0x2cd   : > { %1490 = vmatmul.mubr.bf16.gmra.mrb[68].mxu0 %v4041_v41 }
 0x2ce   : > { %1499 = vmatprep.mubr.bf16.mxu0 %v3713_v49 }
 0x2d5   : > { %1500 = vmatmul.mubr.bf16.gmra.mrb[72].mxu0 %v790_v63 }
 0x2d6   : > { %1509 = vmatprep.mubr.bf16.mxu0 %v3713_v49  ;;  %v4102_v49 = vrot.slane %v4094_v8, %v868_v7 }
 0x2dd   : > { %1510 = vmatmul.mubr.bf16.gmra.mrb[76].mxu0 %v791_v62 }
 0x338   : > { %v1215_v14 = vpop.f32.mrb[16].mxu0  ;;  %v1328_v15 = vpop.f32.mrb[16].mxu1 }
 0x339   : > { %v1216_v16 = vadd.f32 %v1215_v14, %v4099_v11  ;;  %v1329_v17 = vadd.f32 %v1328_v15, %v4102_v49  ;;  %v1217_v18 = vpop.f32.mrb[17].mxu0  ;;  %v1330_v19 = vpop.f32.mrb[17].mxu1 }
 0x33a   : > { %v1218_v20 = vadd.f32 %v1217_v18, %v4105_v12  ;;  %v1331_v21 = vadd.f32 %v1330_v19, %v4108_v13  ;;  %v1219_v22 = vpop.f32.mrb[18].mxu0  ;;  %v1332_v23 = vpop.f32.mrb[18].mxu1 }
 0x33b   : > { %v2614_v24 = vmul.f32 -1.442695, %v1216_v16  ;;  %v2616_v25 = vmul.f32 -1.442695, %v1329_v17  ;;  %v1220_v26 = vadd.f32 %v1219_v22, %v4099_v11  ;;  %v1333_v27 = vadd.f32 %v1332_v23, %v4102_v49  ;;  %v1221_v28 = vpop.f32.mrb[19].mxu0  ;;  %v1334_v29 = vpop.f32.mrb[19].mxu1 }
 0x33c   : > { %v2615_v30 = vmul.f32 -1.442695, %v1218_v20  ;;  %v2617_v31 = vmul.f32 -1.442695, %v1331_v21  ;;  %v1222_v32 = vadd.f32 %v1221_v28, %v4105_v12  ;;  %v1335_v33 = vadd.f32 %v1334_v29, %v4108_v13 }
 0x33d   : > { %3066 = vpow2.f32 %v2614_v24  ;;  %v2621_v34 = vmul.f32 -1.442695, %v1220_v26  ;;  %v2623_v35 = vmul.f32 -1.442695, %v1333_v27 }
 0x33e   : > { %3068 = vpow2.f32 %v2616_v25  ;;  %v2622_v36 = vmul.f32 -1.442695, %v1222_v32  ;;  %v2624_v38 = vmul.f32 -1.442695, %v1335_v33 }
 0x33f   : > { %3070 = vpow2.f32 %v2615_v30 }
 0x340   : > { %3072 = vpow2.f32 %v2617_v31  ;;  %v1225_v39 = vpop.f32.mrb[20].mxu0  ;;  %v1338_v40 = vpop.f32.mrb[20].mxu1 }
 0x341   : > { %3074 = vpow2.f32 %v2621_v34  ;;  %v1226_v41 = vadd.f32 %v1225_v39, %v4099_v11  ;;  %v1339_v42 = vadd.f32 %v1338_v40, %v4102_v49  ;;  %v1227_v43 = vpop.f32.mrb[21].mxu0  ;;  %v1340_v44 = vpop.f32.mrb[21].mxu1 }
 0x342   : > { %3076 = vpow2.f32 %v2623_v35  ;;  %v1228_v45 = vadd.f32 %v1227_v43, %v4105_v12  ;;  %v1341_v46 = vadd.f32 %v1340_v44, %v4108_v13  ;;  %v1229_v37 = vpop.f32.mrb[22].mxu0  ;;  %v1342_v47 = vpop.f32.mrb[22].mxu1 }
 0x343   : > { %3078 = vpow2.f32 %v2622_v36  ;;  %v2628_v48 = vmul.f32 -1.442695, %v1226_v41  ;;  %v2630_v50 = vmul.f32 -1.442695, %v1339_v42  ;;  %v1230_v51 = vadd.f32 %v1229_v37, %v4099_v11  ;;  %v1231_v53 = vpop.f32.mrb[23].mxu0  ;;  %v1344_v54 = vpop.f32.mrb[23].mxu1 }
 0x344   : > { %3080 = vpow2.f32 %v2624_v38  ;;  %v2629_v55 = vmul.f32 -1.442695, %v1228_v45  ;;  %v2631_v56 = vmul.f32 -1.442695, %v1341_v46  ;;  %v1343_v23 = vadd.f32 %v1342_v47, %v4102_v49 }
 0x345   : > { %3082 = vpow2.f32 %v2628_v48  ;;  %v2635_v57 = vmul.f32 -1.442695, %v1230_v51  ;;  %v1232_v26 = vadd.f32 %v1231_v53, %v4105_v12  ;;  %v1345_v30 = vadd.f32 %v1344_v54, %v4108_v13 }
 0x346   : > { %3084 = vpow2.f32 %v2630_v50  ;;  %v2637_v41 = vmul.f32 -1.442695, %v1343_v23 }
 0x347   : > { %v3067_v58 = vpop.eup %3066  ;;  %3086 = vpow2.f32 %v2629_v55  ;;  %v2636_v37 = vmul.f32 -1.442695, %v1232_v26  ;;  %v2638_v51 = vmul.f32 -1.442695, %v1345_v30 }
 0x348   : > { %v3069_v59 = vpop.eup %3068  ;;  %v1953_v60 = vadd.f32 1.0, %v3067_v58  ;;  %3088 = vpow2.f32 %v2631_v56  ;;  %v1235_v61 = vpop.f32.mrb[24].mxu0 }
 0x349   : > { %v1348_v62 = vpop.f32.mrb[24].mxu1  ;;  %v3071_v63 = vpop.eup %3070  ;;  %v1955_v0 = vadd.f32 1.0, %v3069_v59  ;;  %3090 = vpow2.f32 %v2635_v57  ;;  %v1236_v35 = vadd.f32 %v1235_v61, %v4099_v11 }
 0x34a   : > { %v1237_v2 = vpop.f32.mrb[25].mxu0  ;;  %v1350_v4 = vpop.f32.mrb[25].mxu1  ;;  %3092 = vrcp.f32 %v1953_v60  ;;  %v1954_v5 = vadd.f32 1.0, %v3071_v63  ;;  %v1349_v42 = vadd.f32 %v1348_v62, %v4102_v49 }
 0x34b   : > { %v3073_v52 = vpop.eup %3072  ;;  %v1239_v1 = vpop.f32.mrb[26].mxu0  ;;  %3094 = vrcp.f32 %v1955_v0  ;;  %v1238_v47 = vadd.f32 %v1237_v2, %v4105_v12  ;;  %v1351_v53 = vadd.f32 %v1350_v4, %v4108_v13  ;;  %v2642_v55 = vmul.f32 -1.442695, %v1236_v35 }
 0x34c   : > { %v4123_v6 = vpop.f32.mrb[26].mxu1  ;;  %v3075_v7 = vpop.eup %3074  ;;  %v1956_v9 = vadd.f32 1.0, %v3073_v52  ;;  %3096 = vrcp.f32 %v1954_v5  ;;  %v1240_v56 = vadd.f32 %v1239_v1, %v4099_v11  ;;  %v2644_v58 = vmul.f32 -1.442695, %v1349_v42 }
 0x34d   : > { %v4125_v10 = vpop.f32.mrb[27].mxu0  ;;  %v3077_v14 = vpop.eup %3076  ;;  %v1960_v15 = vadd.f32 1.0, %v3075_v7  ;;  %v1353_v59 = vadd.f32 %v4123_v6, %v4102_v49  ;;  %v2643_v61 = vmul.f32 -1.442695, %v1238_v47  ;;  %v2645_v4 = vmul.f32 -1.442695, %v1351_v53 }
 0x34e   : > { %v4127_v16 = vpop.f32.mrb[27].mxu1  ;;  %v3079_v17 = vpop.eup %3078  ;;  %3098 = vrcp.f32 %v1956_v9  ;;  %v1962_v18 = vadd.f32 1.0, %v3077_v14  ;;  %v1242_v62 = vadd.f32 %v4125_v10, %v4105_v12  ;;  %v2649_v7 = vmul.f32 -1.442695, %v1240_v56 }
 0x34f   : > { %v3081_v19 = vpop.eup %3080  ;;  %3100 = vrcp.f32 %v1960_v15  ;;  %v1961_v20 = vadd.f32 1.0, %v3079_v17  ;;  %v1355_v52 = vadd.f32 %v4127_v16, %v4108_v13  ;;  %v2651_v16 = vmul.f32 -1.442695, %v1353_v59 }
 0x350   : > { %v3083_v21 = vpop.eup %3082  ;;  %3102 = vrcp.f32 %v1962_v18  ;;  %v1963_v22 = vadd.f32 1.0, %v3081_v19  ;;  %v1245_v27 = vpop.f32.mrb[28].mxu0 }
 0x351   : > { %v3085_v24 = vpop.eup %3084  ;;  %3104 = vrcp.f32 %v1961_v20  ;;  %v1967_v25 = vadd.f32 1.0, %v3083_v21  ;;  %v1358_v31 = vpop.f32.mrb[28].mxu1  ;;  %v1246_v9 = vadd.f32 %v1245_v27, %v4099_v11  ;;  %v2650_v21 = vmul.f32 -1.442695, %v1242_v62 }
 0x352   : > { %v3087_v28 = vpop.eup %3086  ;;  %3106 = vrcp.f32 %v1963_v22  ;;  %v1969_v29 = vadd.f32 1.0, %v3085_v24  ;;  %v4133_v32 = vpop.f32.mrb[29].mxu0  ;;  %v1359_v17 = vadd.f32 %v1358_v31, %v4102_v49  ;;  %v2652_v23 = vmul.f32 -1.442695, %v1355_v52 }
 0x353   : > { %v3089_v33 = vpop.eup %3088  ;;  %3108 = vrcp.f32 %v1967_v25  ;;  %v1968_v34 = vadd.f32 1.0, %v3087_v28  ;;  %v4136_v36 = vpop.f32.mrb[29].mxu1  ;;  %v2656_v26 = vmul.f32 -1.442695, %v1246_v9  ;;  %v1248_v53 = vadd.f32 %v4133_v32, %v4105_v12 }
 0x354   : > { %v4138_v38 = vpop.f32.mrb[30].mxu0  ;;  %v3091_v39 = vpop.eup %3090  ;;  %3110 = vrcp.f32 %v1969_v29  ;;  %v1970_v40 = vadd.f32 1.0, %v3089_v33  ;;  %v2658_v28 = vmul.f32 -1.442695, %v1359_v17 }
 0x355   : > { %v4141_v43 = vpop.f32.mrb[30].mxu1  ;;  %v4143_v44 = vpop.f32.mrb[31].mxu0  ;;  %3112 = vrcp.f32 %v1968_v34  ;;  %v1974_v46 = vadd.f32 1.0, %v3091_v39  ;;  %v1250_v17 = vadd.f32 %v4138_v38, %v4099_v11 }
 0x356   : > { %v3093_v45 = vpop.eup %3092  ;;  %v4146_v48 = vpop.f32.mrb[31].mxu1  ;;  %3114 = vrcp.f32 %v1970_v40 }
 0x357   : > { %v3095_v50 = vpop.eup %3094  ;;  %2289 = vst [vmem:[%s4150_s19] sm:$0xff] %v3093_v45  ;;  %3116 = vrcp.f32 %v1974_v46 }
 0x358   : > { %v3097_v54 = vpop.eup %3096  ;;  %2291 = vst [vmem:[%s4150_s19 + $0x10] sm:$0xff] %v3095_v50  ;;  %3118 = vpow2.f32 %v2637_v41  ;;  %v4162_v63 = vpop.f32.mrb[32].mxu0 }
 0x359   : > { %v3099_v57 = vpop.eup %3098  ;;  %2290 = vst [vmem:[%s4150_s19 + $0x8] sm:$0xff] %v3097_v54  ;;  %3120 = vpow2.f32 %v2636_v37  ;;  %v4164_v0 = vpop.f32.mrb[32].mxu1 }
 0x35a   : > { %v3101_v60 = vpop.eup %3100  ;;  %2292 = vst [vmem:[%s4150_s19 + $0x18] sm:$0xff] %v3099_v57  ;;  %3122 = vpow2.f32 %v2638_v51  ;;  %v4169_v5 = vpop.f32.mrb[33].mxu0  ;;  %v1361_v57 = vadd.f32 %v4136_v36, %v4108_v13 }
 0x35b   : > { %v3103_v2 = vpop.eup %3102  ;;  %2296 = vst [vmem:[%s4150_s19 + $0x38] sm:$0xff] %v3101_v60  ;;  %v4171_v1 = vpop.f32.mrb[33].mxu1  ;;  %3124 = vpow2.f32 %v2642_v55 }
 0x35c   : > { %v3105_v6 = vpop.eup %3104  ;;  %2298 = vst [vmem:[%s4150_s19 + $0x48] sm:$0xff] %v3103_v2  ;;  %v4175_v10 = vpop.f32.mrb[34].mxu0  ;;  %3126 = vpow2.f32 %v2644_v58 }
 0x35d   : > { %v4177_v14 = vpop.f32.mrb[34].mxu1  ;;  %v3107_v15 = vpop.eup %3106  ;;  %2297 = vst [vmem:[%s4150_s19 + $0x40] sm:$0xff] %v3105_v6  ;;  %3128 = vpow2.f32 %v2643_v61 }
 0x35e   : > { %v4181_v18 = vpop.f32.mrb[35].mxu0  ;;  %v1374_v19 = vpop.f32.mrb[35].mxu1  ;;  %2299 = vst [vmem:[%s4150_s19 + $0x50] sm:$0xff] %v3107_v15  ;;  %3130 = vpow2.f32 %v2645_v4 }
 0x35f   : > { %v3109_v20 = vpop.eup %3108  ;;  %v4186_v24 = vadd.f32 %v1374_v19, %v4108_v13  ;;  %3132 = vpow2.f32 %v2649_v7  ;;  %v2657_v7 = vmul.f32 -1.442695, %v1248_v53 }
 0x360   : > { %v3111_v22 = vpop.eup %3110  ;;  %2303 = vst [vmem:[%s4150_s19 + $0x70] sm:$0xff] %v3109_v20  ;;  %3134 = vpow2.f32 %v2651_v16  ;;  %v1265_v30 = vpop.f32.mrb[36].mxu0  ;;  %v4220_v16 = vmul.f32 -1.442695, %v1361_v57 }
 0x361   : > { %v3113_v25 = vpop.eup %3112  ;;  %2305 = vst [vmem:[%s4150_s19 + $0x80] sm:$0xff] %v3111_v22  ;;  %3136 = vpow2.f32 %v2650_v21  ;;  %v1378_v31 = vpop.f32.mrb[36].mxu1  ;;  %v4193_v34 = vadd.f32 %v1265_v30, %v4099_v11  ;;  %v1363_v22 = vadd.f32 %v4141_v43, %v4102_v49  ;;  %v1252_v43 = vadd.f32 %v4143_v44, %v4105_v12 }
 0x362   : > { %v3115_v27 = vpop.eup %3114  ;;  %2304 = vst [vmem:[%s4150_s19 + $0x78] sm:$0xff] %v3113_v25  ;;  %3138 = vpow2.f32 %v2652_v23  ;;  %v4196_v35 = vadd.f32 %v1378_v31, %v4102_v49  ;;  %v1267_v39 = vpop.f32.mrb[37].mxu0  ;;  %v1256_v44 = vadd.f32 %v4162_v63, %v4099_v11  ;;  %v1369_v63 = vadd.f32 %v4164_v0, %v4102_v49 }
 0x363   : > { %v3117_v29 = vpop.eup %3116  ;;  %2306 = vst [vmem:[%s4150_s19 + $0x88] sm:$0xff] %v3115_v27  ;;  %v1380_v40 = vpop.f32.mrb[37].mxu1  ;;  %3140 = vpow2.f32 %v2656_v26  ;;  %v4199_v45 = vadd.f32 %v1267_v39, %v4105_v12  ;;  %v1371_v0 = vadd.f32 %v4171_v1, %v4108_v13 }
 0x364   : > { %v3119_v33 = vpop.eup %3118  ;;  %2310 = vst [vmem:[%s4150_s19 + $0xa8] sm:$0xff] %v3117_v29  ;;  %v4202_v46 = vadd.f32 %v1380_v40, %v4108_v13  ;;  %v1269_v37 = vpop.f32.mrb[38].mxu0  ;;  %3142 = vpow2.f32 %v2658_v28 }
 0x365   : > { %v3121_v41 = vpop.eup %3120  ;;  %v1976_v42 = vadd.f32 1.0, %v3119_v33  ;;  %v1382_v47 = vpop.f32.mrb[38].mxu1  ;;  %v4209_v61 = vadd.f32 %v1269_v37, %v4099_v11 }
 0x366   : > { %v3123_v50 = vpop.eup %3122  ;;  %v1975_v51 = vadd.f32 1.0, %v3121_v41  ;;  %v1271_v54 = vpop.f32.mrb[39].mxu0  ;;  %v4212_v62 = vadd.f32 %v1382_v47, %v4102_v49 }
 0x367   : > { %v3125_v55 = vpop.eup %3124  ;;  %3144 = vrcp.f32 %v1976_v42  ;;  %v1977_v56 = vadd.f32 1.0, %v3123_v50  ;;  %v1384_v58 = vpop.f32.mrb[39].mxu1  ;;  %v4215_v4 = vadd.f32 %v1271_v54, %v4105_v12  ;;  %v2663_v50 = vmul.f32 -1.442695, %v1250_v17 }
 0x368   : > { %v3127_v59 = vpop.eup %3126  ;;  %3146 = vrcp.f32 %v1975_v51  ;;  %v1981_v60 = vadd.f32 1.0, %v3125_v55  ;;  %v4218_v52 = vadd.f32 %v1384_v58, %v4108_v13  ;;  %v1275_v19 = vpop.f32.mrb[40].mxu0  ;;  %v1365_v51 = vadd.f32 %v4146_v48, %v4108_v13 }
 0x369   : > { %v3129_v2 = vpop.eup %3128  ;;  %3148 = vrcp.f32 %v1977_v56  ;;  %v1983_v32 = vadd.f32 1.0, %v3127_v59  ;;  %v4227_v23 = vadd.f32 %v1275_v19, %v4099_v11  ;;  %v1388_v25 = vpop.f32.mrb[40].mxu1 }
 0x36a   : > { %v3131_v36 = vpop.eup %3130  ;;  %3150 = vrcp.f32 %v1981_v60  ;;  %v1982_v6 = vadd.f32 1.0, %v3129_v2  ;;  %v1277_v26 = vpop.f32.mrb[41].mxu0  ;;  %v4230_v29 = vadd.f32 %v1388_v25, %v4102_v49  ;;  %v2665_v2 = vmul.f32 -1.442695, %v1363_v22 }
 0x36b   : > { %v3133_v9 = vpop.eup %3132  ;;  %3152 = vrcp.f32 %v1983_v32  ;;  %v1984_v15 = vadd.f32 1.0, %v3131_v36  ;;  %v4233_v38 = vadd.f32 %v1277_v26, %v4105_v12  ;;  %v1390_v30 = vpop.f32.mrb[41].mxu1 }
 0x36c   : > { %v3135_v20 = vpop.eup %3134  ;;  %3154 = vrcp.f32 %v1982_v6  ;;  %v1988_v21 = vadd.f32 1.0, %v3133_v9  ;;  %v1279_v31 = vpop.f32.mrb[42].mxu0  ;;  %v4238_v40 = vadd.f32 %v1390_v30, %v4108_v13  ;;  %v2664_v6 = vmul.f32 -1.442695, %v1252_v43 }
 0x36d   : > { %v3137_v27 = vpop.eup %3136  ;;  %3156 = vrcp.f32 %v1984_v15  ;;  %v1990_v28 = vadd.f32 1.0, %v3135_v20  ;;  %v1392_v41 = vpop.f32.mrb[42].mxu1  ;;  %v4245_v56 = vadd.f32 %v1279_v31, %v4099_v11  ;;  %v2666_v9 = vmul.f32 -1.442695, %v1365_v51 }
 0x36e   : > { %v3139_v33 = vpop.eup %3138  ;;  %3158 = vrcp.f32 %v1988_v21  ;;  %v1989_v39 = vadd.f32 1.0, %v3137_v27  ;;  %v1281_v42 = vpop.f32.mrb[43].mxu0  ;;  %v4248_v59 = vadd.f32 %v1392_v41, %v4102_v49  ;;  %v1258_v15 = vadd.f32 %v4169_v5, %v4105_v12 }
 0x36f   : > { %v3141_v37 = vpop.eup %3140  ;;  %3160 = vrcp.f32 %v1990_v28  ;;  %v1991_v47 = vadd.f32 1.0, %v3139_v33  ;;  %v1394_v53 = vpop.f32.mrb[43].mxu1  ;;  %v4251_v60 = vadd.f32 %v1281_v42, %v4105_v12  ;;  %v2670_v5 = vmul.f32 -1.442695, %v1256_v44 }
 0x370   : > { %v3143_v54 = vpop.eup %3142  ;;  %3162 = vrcp.f32 %v1989_v39  ;;  %v1995_v55 = vadd.f32 1.0, %v3141_v37  ;;  %v4257_v32 = vadd.f32 %v1394_v53, %v4108_v13  ;;  %v1285_v17 = vpop.f32.mrb[44].mxu0  ;;  %v2672_v33 = vmul.f32 -1.442695, %v1369_v63 }
 0x371   : > { %v3145_v57 = vpop.eup %3144  ;;  %3164 = vrcp.f32 %v1991_v47  ;;  %v1997_v58 = vadd.f32 1.0, %v3143_v54  ;;  %v1398_v19 = vpop.f32.mrb[44].mxu1  ;;  %v4266_v21 = vadd.f32 %v1285_v17, %v4099_v11  ;;  %v1260_v39 = vadd.f32 %v4175_v10, %v4099_v11 }
 0x372   : > { %v3147_v48 = vpop.eup %3146  ;;  %2312 = vst [vmem:[%s4150_s19 + $0xb8] sm:$0xff] %v3145_v57  ;;  %3166 = vrcp.f32 %v1995_v55  ;;  %v4269_v22 = vadd.f32 %v1398_v19, %v4102_v49  ;;  %v1287_v25 = vpop.f32.mrb[45].mxu0  ;;  %v2671_v37 = vmul.f32 -1.442695, %v1258_v15  ;;  %v1373_v47 = vadd.f32 %v4177_v14, %v4102_v49 }
 0x373   : > { %v3149_v36 = vpop.eup %3148  ;;  %2311 = vst [vmem:[%s4150_s19 + $0xb0] sm:$0xff] %v3147_v48  ;;  %3168 = vrcp.f32 %v1997_v58  ;;  %v1400_v26 = vpop.f32.mrb[45].mxu1  ;;  %v4274_v28 = vadd.f32 %v1287_v25, %v4105_v12  ;;  %v2673_v14 = vmul.f32 -1.442695, %v1371_v0  ;;  %v2677_v55 = vmul.f32 -1.442695, %v1260_v39 }
 0x374   : > { %v3151_v20 = vpop.eup %3150  ;;  %2313 = vst [vmem:[%s4150_s19 + $0xc0] sm:$0xff] %v3149_v36  ;;  %3170 = vpow2.f32 %v2657_v7  ;;  %v4277_v7 = vadd.f32 %v1400_v26, %v4108_v13  ;;  %v1289_v1 = vpop.f32.mrb[46].mxu0 }
 0x375   : > { %v3153_v27 = vpop.eup %3152  ;;  %2317 = vst [vmem:[%s4150_s19 + $0xe0] sm:$0xff] %v3151_v20  ;;  %3172 = vpow2.f32 %v4220_v16  ;;  %v1402_v30 = vpop.f32.mrb[46].mxu1  ;;  %v4283_v43 = vadd.f32 %v1289_v1, %v4099_v11  ;;  %v1262_v11 = vadd.f32 %v4181_v18, %v4105_v12  ;;  %v2679_v18 = vmul.f32 -1.442695, %v1373_v47 }
 0x376   : > { %v3155_v31 = vpop.eup %3154  ;;  %2319 = vst [vmem:[%s4150_s19 + $0xf0] sm:$0xff] %v3153_v27  ;;  %3174 = vpow2.f32 %v2663_v50  ;;  %v1291_v16 = vpop.f32.mrb[47].mxu0  ;;  %v4289_v50 = vadd.f32 %v1402_v30, %v4102_v49 }
 0x377   : > { %v1404_v41 = vpop.f32.mrb[47].mxu1  ;;  %v3157_v42 = vpop.eup %3156  ;;  %2318 = vst [vmem:[%s4150_s19 + $0xe8] sm:$0xff] %v3155_v31  ;;  %3176 = vpow2.f32 %v2665_v2  ;;  %v4295_v10 = vadd.f32 %v1291_v16, %v4105_v12  ;;  %v2678_v58 = vmul.f32 -1.442695, %v1262_v11 }
 0x378   : > { %v3159_v51 = vpop.eup %3158  ;;  %2320 = vst [vmem:[%s4150_s19 + $0xf8] sm:$0xff] %v3157_v42  ;;  %3178 = vpow2.f32 %v2664_v6  ;;  %v4298_v53 = vadd.f32 %v1404_v41, %v4108_v13  ;;  %v4303_v12 = vpop.f32.mrb[48].mxu0 }
 0x379   : > { %v3161_v54 = vpop.eup %3160  ;;  %2324 = vst [vmem:[%s4150_s19 + $0x118] sm:$0xff] %v3159_v51  ;;  %3180 = vpow2.f32 %v2666_v9  ;;  %v4305_v57 = vpop.f32.mrb[48].mxu1 }
 0x37a   : > { %v3163_v49 = vpop.eup %3162  ;;  %2326 = vst [vmem:[%s4150_s19 + $0x128] sm:$0xff] %v3161_v54  ;;  %3182 = vpow2.f32 %v2670_v5  ;;  %v4308_v48 = vpop.f32.mrb[49].mxu0 }
 0x37b   : > { %v3165_v44 = vpop.eup %3164  ;;  %2325 = vst [vmem:[%s4150_s19 + $0x120] sm:$0xff] %v3163_v49  ;;  %3184 = vpow2.f32 %v2672_v33  ;;  %v4310_v2 = vpop.f32.mrb[49].mxu1 }
 0x37c   : > { %v3167_v13 = vpop.eup %3166  ;;  %2327 = vst [vmem:[%s4150_s19 + $0x130] sm:$0xff] %v3165_v44  ;;  %3186 = vpow2.f32 %v2671_v37  ;;  %v4313_v36 = vpop.f32.mrb[50].mxu0 }
 0x37d   : > { %v3169_v63 = vpop.eup %3168  ;;  %2331 = vst [vmem:[%s4150_s19 + $0x150] sm:$0xff] %v3167_v13  ;;  %3188 = vpow2.f32 %v2673_v14  ;;  %v4315_v6 = vpop.f32.mrb[50].mxu1 }
 0x37e   : > { %v3171_v9 = vpop.eup %3170  ;;  %2333 = vst [vmem:[%s4150_s19 + $0x160] sm:$0xff] %v3169_v63  ;;  %3190 = vpow2.f32 %v2677_v55  ;;  %v4318_v15 = vpop.f32.mrb[51].mxu0 }
 0x37f   : > { %v4320_v17 = vpop.f32.mrb[51].mxu1  ;;  %v3173_v19 = vpop.eup %3172  ;;  %v1996_v20 = vadd.f32 1.0, %v3171_v9  ;;  %3192 = vpow2.f32 %v2679_v18 }
 0x380   : > { %v3175_v0 = vpop.eup %3174  ;;  %v1998_v25 = vadd.f32 1.0, %v3173_v19  ;;  %3194 = vpow2.f32 %v2678_v58  ;;  %v4322_v33 = vpop.f32.mrb[52].mxu0 }
 0x381   : > { %v3177_v26 = vpop.eup %3176  ;;  %3196 = vrcp.f32 %v1996_v20  ;;  %v2002_v27 = vadd.f32 1.0, %v3175_v0  ;;  %v4324_v41 = vpop.f32.mrb[52].mxu1 }
 0x382   : > { %v3179_v5 = vpop.eup %3178  ;;  %3198 = vrcp.f32 %v1998_v25  ;;  %v2004_v1 = vadd.f32 1.0, %v3177_v26  ;;  %v4326_v42 = vpop.f32.mrb[53].mxu0  ;;  %v2680_v25 = vmul.f32 -1.442695, %v4186_v24  ;;  %v2685_v24 = vmul.f32 -1.442695, %v4199_v45 }
 0x383   : > { %v3181_v30 = vpop.eup %3180  ;;  %3200 = vrcp.f32 %v2002_v27  ;;  %v2003_v31 = vadd.f32 1.0, %v3179_v5  ;;  %v4328_v51 = vpop.f32.mrb[53].mxu1  ;;  %v2684_v5 = vmul.f32 -1.442695, %v4193_v34  ;;  %v2691_v45 = vmul.f32 -1.442695, %v4209_v61 }
 0x384   : > { %v3183_v39 = vpop.eup %3182  ;;  %3202 = vrcp.f32 %v2004_v1  ;;  %v2005_v16 = vadd.f32 1.0, %v3181_v30  ;;  %v4330_v11 = vpop.f32.mrb[54].mxu0  ;;  %v2694_v61 = vmul.f32 -1.442695, %v4218_v52 }
 0x385   : > { %v3185_v37 = vpop.eup %3184  ;;  %3204 = vrcp.f32 %v2003_v31  ;;  %v2009_v47 = vadd.f32 1.0, %v3183_v39  ;;  %v4332_v49 = vpop.f32.mrb[54].mxu1  ;;  %v2686_v31 = vmul.f32 -1.442695, %v4196_v35  ;;  %v2687_v35 = vmul.f32 -1.442695, %v4202_v46 }
 0x386   : > { %v3187_v54 = vpop.eup %3186  ;;  %3206 = vrcp.f32 %v2005_v16  ;;  %v2011_v14 = vadd.f32 1.0, %v3185_v37  ;;  %v4334_v55 = vpop.f32.mrb[55].mxu0  ;;  %v876_v46 = vsub.s32 4, %v4087_v3 }
 0x387   : > { %v3189_v44 = vpop.eup %3188  ;;  %3208 = vrcp.f32 %v2009_v47  ;;  %v2010_v18 = vadd.f32 1.0, %v3187_v54  ;;  %v4336_v13 = vpop.f32.mrb[55].mxu1 }
 0x388   : > { %v3191_v58 = vpop.eup %3190  ;;  %3210 = vrcp.f32 %v2011_v14  ;;  %v2012_v63 = vadd.f32 1.0, %v3189_v44  ;;  %v4340_v1 = vpop.f32.mrb[56].mxu0 }
 0x389   : > { %v3193_v9 = vpop.eup %3192  ;;  %3212 = vrcp.f32 %v2010_v18  ;;  %v2016_v19 = vadd.f32 1.0, %v3191_v58  ;;  %v4344_v39 = vpop.f32.mrb[56].mxu1 }
 0x38a   : > { %v3195_v20 = vpop.eup %3194  ;;  %3214 = vrcp.f32 %v2012_v63  ;;  %v2018_v0 = vadd.f32 1.0, %v3193_v9  ;;  %v4346_v16 = vpop.f32.mrb[57].mxu0  ;;  %v2693_v9 = vmul.f32 -1.442695, %v4212_v62 }
 0x38b   : > { %v3197_v26 = vpop.eup %3196  ;;  %3216 = vrcp.f32 %v2016_v19  ;;  %v2017_v27 = vadd.f32 1.0, %v3195_v20  ;;  %v4350_v47 = vpop.f32.mrb[57].mxu1  ;;  %v2692_v20 = vmul.f32 -1.442695, %v4215_v4  ;;  %v2700_v4 = vmul.f32 -1.442695, %v4230_v29 }
 0x38c   : > { %v3199_v30 = vpop.eup %3198  ;;  %2332 = vst [vmem:[%s4150_s19 + $0x158] sm:$0xff] %v3197_v26  ;;  %3218 = vrcp.f32 %v2018_v0  ;;  %v4352_v34 = vpop.f32.mrb[58].mxu0  ;;  %v2698_v26 = vmul.f32 -1.442695, %v4227_v23  ;;  %v2699_v23 = vmul.f32 -1.442695, %v4233_v38 }
 0x38d   : > { %v3201_v37 = vpop.eup %3200  ;;  %2334 = vst [vmem:[%s4150_s19 + $0x168] sm:$0xff] %v3199_v30  ;;  %3220 = vrcp.f32 %v2017_v27  ;;  %v4356_v14 = vpop.f32.mrb[58].mxu1  ;;  %v4380_v30 = vrot.slane %v4094_v8, %v876_v46  ;;  %v2701_v8 = vmul.f32 -1.442695, %v4238_v40 }
 0x38e   : > { %v3203_v54 = vpop.eup %3202  ;;  %2338 = vst [vmem:[%s4150_s19 + $0x188] sm:$0xff] %v3201_v37  ;;  %3222 = vpow2.f32 %v2680_v25  ;;  %v4358_v44 = vpop.f32.mrb[59].mxu0 }
 0x38f   : > { %v3205_v18 = vpop.eup %3204  ;;  %2340 = vst [vmem:[%s4150_s19 + $0x198] sm:$0xff] %v3203_v54  ;;  %3224 = vpow2.f32 %v2684_v5  ;;  %v4362_v58 = vpop.f32.mrb[59].mxu1 }
 0x390   : > { %v3207_v63 = vpop.eup %3206  ;;  %2339 = vst [vmem:[%s4150_s19 + $0x190] sm:$0xff] %v3205_v18  ;;  %3226 = vpow2.f32 %v2686_v31  ;;  %v4373_v62 = vpop.f32.mrb[60].mxu0 }
 0x391   : > { %v3209_v19 = vpop.eup %3208  ;;  %2341 = vst [vmem:[%s4150_s19 + $0x1a0] sm:$0xff] %v3207_v63  ;;  %3228 = vpow2.f32 %v2685_v24  ;;  %v4375_v27 = vpop.f32.mrb[60].mxu1 }
 0x392   : > { %v3211_v0 = vpop.eup %3210  ;;  %2345 = vst [vmem:[%s4150_s19 + $0x1c0] sm:$0xff] %v3209_v19  ;;  %3230 = vpow2.f32 %v2687_v35  ;;  %v4382_v31 = vpop.f32.mrb[61].mxu0 }
 0x393   : > { %v3213_v25 = vpop.eup %3212  ;;  %2347 = vst [vmem:[%s4150_s19 + $0x1d0] sm:$0xff] %v3211_v0  ;;  %3232 = vpow2.f32 %v2691_v45  ;;  %v4384_v52 = vpop.f32.mrb[61].mxu1 }
 0x394   : > { %v3215_v5 = vpop.eup %3214  ;;  %2346 = vst [vmem:[%s4150_s19 + $0x1c8] sm:$0xff] %v3213_v25  ;;  %3234 = vpow2.f32 %v2693_v9  ;;  %v1475_v24 = vpop.f32.mrb[62].mxu0 }
 0x395   : > { %v3217_v37 = vpop.eup %3216  ;;  %2348 = vst [vmem:[%s4150_s19 + $0x1d8] sm:$0xff] %v3215_v5  ;;  %3236 = vpow2.f32 %v2692_v20  ;;  %v4388_v54 = vpop.f32.mrb[62].mxu1  ;;  %v4393_v29 = vadd.f32 %v1475_v24, %v4380_v30 }
 0x396   : > { %v3219_v35 = vpop.eup %3218  ;;  %2352 = vst [vmem:[%s4150_s19 + $0x1f8] sm:$0xff] %v3217_v37  ;;  %3238 = vpow2.f32 %v2694_v61  ;;  %v4395_v18 = vpop.f32.mrb[63].mxu0 }
 0x397   : > { %v4397_v45 = vpop.f32.mrb[63].mxu1  ;;  %v3221_v63 = vpop.eup %3220  ;;  %2354 = vst [vmem:[%s4150_s19 + $0x208] sm:$0xff] %v3219_v35  ;;  %3240 = vpow2.f32 %v2698_v26 }
 0x398   : > { %v3223_v9 = vpop.eup %3222  ;;  %2353 = vst [vmem:[%s4150_s19 + $0x200] sm:$0xff] %v3221_v63  ;;  %3242 = vpow2.f32 %v2700_v4  ;;  %v1481_v61 = vpop.f32.mrb[64].mxu0 }
 0x399   : > { %v3225_v38 = vpop.eup %3224  ;;  %v2019_v46 = vadd.f32 1.0, %v3223_v9  ;;  %3244 = vpow2.f32 %v2699_v23  ;;  %v4402_v37 = vadd.f32 %v1481_v61, %v4380_v30  ;;  %v4404_v26 = vpop.f32.mrb[65].mxu0 }
 0x39a   : > { %v3227_v19 = vpop.eup %3226  ;;  %v2023_v20 = vadd.f32 1.0, %v3225_v38  ;;  %3246 = vpow2.f32 %v2701_v8  ;;  %v1485_v35 = vpop.f32.mrb[66].mxu0 }
 0x39b   : > { %v3229_v40 = vpop.eup %3228  ;;  %3248 = vrcp.f32 %v2019_v46  ;;  %v2025_v0 = vadd.f32 1.0, %v3227_v19  ;;  %4704 = vst [vmem:[#allocation16_spill] sm:$0xff] %v4402_v37  ;;  %v4407_v8 = vadd.f32 %v1485_v35, %v4380_v30  ;;  %v4409_v9 = vpop.f32.mrb[67].mxu0 }
 0x39c   : > { %v3231_v25 = vpop.eup %3230  ;;  %3250 = vrcp.f32 %v2023_v20  ;;  %v2024_v5 = vadd.f32 1.0, %v3229_v40 }
 0x39d   : > { %v3233_v24 = vpop.eup %3232  ;;  %3252 = vrcp.f32 %v2025_v0  ;;  %v2026_v4 = vadd.f32 1.0, %v3231_v25  ;;  %4705 = vst [vmem:[#allocation17_spill] sm:$0xff] %v4407_v8  ;;  %v880_v0 = vsub.s32 5, %v4087_v3 }
 0x39e   : > { %v3235_v23 = vpop.eup %3234  ;;  %3254 = vrcp.f32 %v2024_v5  ;;  %v2030_v63 = vadd.f32 1.0, %v3233_v24 }
 0x39f   : > { %v3237_v38 = vpop.eup %3236  ;;  %3256 = vrcp.f32 %v2026_v4  ;;  %v2032_v46 = vadd.f32 1.0, %v3235_v23  ;;  %v2705_v23 = vmul.f32 -1.442695, %v4245_v56 }
 0x3a0   : > { %v3239_v19 = vpop.eup %3238  ;;  %3258 = vrcp.f32 %v2030_v63  ;;  %v2031_v20 = vadd.f32 1.0, %v3237_v38  ;;  %v1491_v8 = vpop.f32.mrb[68].mxu0 }
 0x3a1   : > { %v3241_v40 = vpop.eup %3240  ;;  %3260 = vrcp.f32 %v2032_v46  ;;  %v2033_v61 = vadd.f32 1.0, %v3239_v19  ;;  %v4414_v63 = vadd.f32 %v1491_v8, %v4380_v30  ;;  %v4416_v38 = vpop.f32.mrb[69].mxu0 }
 0x3a2   : > { %v3243_v25 = vpop.eup %3242  ;;  %3262 = vrcp.f32 %v2031_v20  ;;  %v2037_v5 = vadd.f32 1.0, %v3241_v40  ;;  %v2707_v20 = vmul.f32 -1.442695, %v4248_v59  ;;  %v4422_v40 = vld [vmem:[%s4683_s6] sm:$0xff]  ;;  %v1495_v56 = vpop.f32.mrb[70].mxu0 }
 0x3a3   : > { %v3245_v24 = vpop.eup %3244  ;;  %3264 = vrcp.f32 %v2033_v61  ;;  %v2039_v35 = vadd.f32 1.0, %v3243_v25  ;;  %v4425_v61 = vrot.slane %v4422_v40, %v880_v0  ;;  %v2706_v25 = vmul.f32 -1.442695, %v4251_v60  ;;  %v1497_v59 = vpop.f32.mrb[71].mxu0 }
 0x3a4   : > { %v3247_v37 = vpop.eup %3246  ;;  %3266 = vrcp.f32 %v2037_v5  ;;  %v2038_v4 = vadd.f32 1.0, %v3245_v24  ;;  %v2708_v24 = vmul.f32 -1.442695, %v4257_v32  ;;  %v2712_v60 = vmul.f32 -1.442695, %v4266_v21 }
 0x3a5   : > { %v3249_v46 = vpop.eup %3248  ;;  %3268 = vrcp.f32 %v2039_v35  ;;  %v2040_v19 = vadd.f32 1.0, %v3247_v37  ;;  %v4430_v37 = vadd.f32 %v1495_v56, %v4380_v30  ;;  %v4435_v0 = vadd.f32 %v1497_v59, %v4425_v61 }
 0x3a6   : > { %v3251_v8 = vpop.eup %3250  ;;  %2355 = vst [vmem:[%s4150_s19 + $0x210] sm:$0xff] %v3249_v46  ;;  %3270 = vrcp.f32 %v2038_v4  ;;  %v2714_v46 = vmul.f32 -1.442695, %v4269_v22  ;;  %v2713_v32 = vmul.f32 -1.442695, %v4274_v28  ;;  %v1442_v22 = vadd.f32 %v4303_v12, %v4380_v30 }
 0x3a7   : > { %v3253_v5 = vpop.eup %3252  ;;  %2359 = vst [vmem:[%s4150_s19 + $0x230] sm:$0xff] %v3251_v8  ;;  %3272 = vrcp.f32 %v2040_v19  ;;  %v2715_v8 = vmul.f32 -1.442695, %v4277_v7  ;;  %v2719_v21 = vmul.f32 -1.442695, %v4283_v43 }
 0x3a8   : > { %v3255_v35 = vpop.eup %3254  ;;  %2361 = vst [vmem:[%s4150_s19 + $0x240] sm:$0xff] %v3253_v5  ;;  %3274 = vpow2.f32 %v2705_v23  ;;  %v1501_v23 = vpop.f32.mrb[72].mxu0  ;;  %v2721_v7 = vmul.f32 -1.442695, %v4289_v50  ;;  %v2720_v43 = vmul.f32 -1.442695, %v4295_v10 }
 0x3a9   : > { %v3257_v4 = vpop.eup %3256  ;;  %2360 = vst [vmem:[%s4150_s19 + $0x238] sm:$0xff] %v3255_v35  ;;  %3276 = vpow2.f32 %v2707_v20  ;;  %v4450_v20 = vadd.f32 %v1501_v23, %v4380_v30  ;;  %v1503_v28 = vpop.f32.mrb[73].mxu0  ;;  %v2722_v50 = vmul.f32 -1.442695, %v4298_v53  ;;  %v884_v23 = vsub.s32 6, %v4087_v3 }
 0x3aa   : > { %v3259_v56 = vpop.eup %3258  ;;  %2362 = vst [vmem:[%s4150_s19 + $0x248] sm:$0xff] %v3257_v4  ;;  %3278 = vpow2.f32 %v2706_v25  ;;  %v4455_v5 = vadd.f32 %v1503_v28, %v4425_v61 }
 0x3ab   : > { %v3261_v19 = vpop.eup %3260  ;;  %2366 = vst [vmem:[%s4150_s19 + $0x268] sm:$0xff] %v3259_v56  ;;  %3280 = vpow2.f32 %v2708_v24  ;;  %v1505_v24 = vpop.f32.mrb[74].mxu0 }
 0x3ac   : > { %v3263_v59 = vpop.eup %3262  ;;  %2368 = vst [vmem:[%s4150_s19 + $0x278] sm:$0xff] %v3261_v19  ;;  %3282 = vpow2.f32 %v2712_v60  ;;  %v4460_v12 = vadd.f32 %v1505_v24, %v4380_v30  ;;  %v1507_v60 = vpop.f32.mrb[75].mxu0  ;;  %v2618_v19 = vmul.f32 -1.442695, %v1442_v22 }
 0x3ad   : > { %v3265_v25 = vpop.eup %3264  ;;  %2367 = vst [vmem:[%s4150_s19 + $0x270] sm:$0xff] %v3263_v59  ;;  %3284 = vpow2.f32 %v2714_v46  ;;  %v4465_v46 = vadd.f32 %v1507_v60, %v4425_v61 }
 0x3ae   : > { %v3267_v35 = vpop.eup %3266  ;;  %2369 = vst [vmem:[%s4150_s19 + $0x280] sm:$0xff] %v3265_v25  ;;  %3286 = vpow2.f32 %v2713_v32 }
 0x3af   : > { %v3269_v4 = vpop.eup %3268  ;;  %2373 = vst [vmem:[%s4150_s19 + $0x2a0] sm:$0xff] %v3267_v35  ;;  %3288 = vpow2.f32 %v2715_v8 }
 0x3b0   : > { %v3271_v56 = vpop.eup %3270  ;;  %2375 = vst [vmem:[%s4150_s19 + $0x2b0] sm:$0xff] %v3269_v4  ;;  %3290 = vpow2.f32 %v2719_v21  ;;  %v1511_v8 = vpop.f32.mrb[76].mxu0  ;;  %v4478_v4 = vrot.slane %v4422_v40, %v884_v23 }
 0x3b1   : > { %v3273_v32 = vpop.eup %3272  ;;  %2374 = vst [vmem:[%s4150_s19 + $0x2a8] sm:$0xff] %v3271_v56  ;;  %3292 = vpow2.f32 %v2721_v7  ;;  %v4472_v24 = vadd.f32 %v1511_v8, %v4380_v30  ;;  %v1513_v21 = vpop.f32.mrb[77].mxu0 }
 0x3b2   : > { %v3275_v10 = vpop.eup %3274  ;;  %2376 = vst [vmem:[%s4150_s19 + $0x2b8] sm:$0xff] %v3273_v32  ;;  %3294 = vpow2.f32 %v2720_v43  ;;  %v4475_v7 = vadd.f32 %v1513_v21, %v4425_v61  ;;  %v1515_v43 = vpop.f32.mrb[78].mxu0  ;;  %v1563_v23 = vadd.f32 %v4305_v57, %v4478_v4 }
 0x3b3   : > { %v3277_v59 = vpop.eup %3276  ;;  %v2044_v28 = vadd.f32 1.0, %v3275_v10  ;;  %3296 = vpow2.f32 %v2722_v50  ;;  %v4481_v50 = vadd.f32 %v1515_v43, %v4380_v30  ;;  %v1517_v56 = vpop.f32.mrb[79].mxu0 }
 0x3b4   : > { %v3279_v53 = vpop.eup %3278  ;;  %v2046_v25 = vadd.f32 1.0, %v3277_v59  ;;  %3298 = vpow2.f32 %v2618_v19  ;;  %v4484_v10 = vadd.f32 %v1517_v56, %v4425_v61 }
 0x3b5   : > { %v3281_v22 = vpop.eup %3280  ;;  %3300 = vrcp.f32 %v2044_v28  ;;  %v2045_v35 = vadd.f32 1.0, %v3279_v53 }
 0x3b6   : > { %v3283_v60 = vpop.eup %3282  ;;  %3302 = vrcp.f32 %v2046_v25  ;;  %v2047_v3 = vadd.f32 1.0, %v3281_v22 }
 0x3b7   : > { %v3285_v19 = vpop.eup %3284  ;;  %3304 = vrcp.f32 %v2045_v35  ;;  %v2051_v32 = vadd.f32 1.0, %v3283_v60  ;;  %v1444_v35 = vadd.f32 %v4308_v48, %v4425_v61  ;;  %v1566_v48 = vadd.f32 %v4315_v6, %v4478_v4 }
 0x3b8   : > { %v3287_v59 = vpop.eup %3286  ;;  %3306 = vrcp.f32 %v2047_v3  ;;  %v2053_v28 = vadd.f32 1.0, %v3285_v19  ;;  %v1555_v3 = vadd.f32 %v4310_v2, %v4478_v4 }
 0x3b9   : > { %v3289_v8 = vpop.eup %3288  ;;  %3308 = vrcp.f32 %v2051_v32  ;;  %v2052_v53 = vadd.f32 1.0, %v3287_v59  ;;  %v1446_v32 = vadd.f32 %v4313_v36, %v4380_v30  ;;  %v2619_v2 = vmul.f32 -1.442695, %v1444_v35 }
 0x3ba   : > { %v3291_v25 = vpop.eup %3290  ;;  %3310 = vrcp.f32 %v2053_v28  ;;  %v2054_v40 = vadd.f32 1.0, %v3289_v8  ;;  %v2634_v28 = vmul.f32 -1.442695, %v1563_v23  ;;  %v2620_v36 = vmul.f32 -1.442695, %v1555_v3 }
 0x3bb   : > { %v3293_v21 = vpop.eup %3292  ;;  %3312 = vrcp.f32 %v2052_v53  ;;  %v2058_v22 = vadd.f32 1.0, %v3291_v25  ;;  %v1448_v25 = vadd.f32 %v4318_v15, %v4425_v61  ;;  %v2625_v6 = vmul.f32 -1.442695, %v1446_v32 }
 0x3bc   : > { %v3295_v43 = vpop.eup %3294  ;;  %3314 = vrcp.f32 %v2054_v40  ;;  %v2060_v60 = vadd.f32 1.0, %v3293_v21  ;;  %v1558_v21 = vadd.f32 %v4320_v17, %v4478_v4  ;;  %v2641_v15 = vmul.f32 -1.442695, %v1566_v48 }
 0x3bd   : > { %v3297_v56 = vpop.eup %3296  ;;  %3316 = vrcp.f32 %v2058_v22  ;;  %v2059_v19 = vadd.f32 1.0, %v3295_v43  ;;  %v1452_v22 = vadd.f32 %v4322_v33, %v4380_v30  ;;  %v1579_v43 = vadd.f32 %v4324_v41, %v4478_v4 }
 0x3be   : > { %v3299_v57 = vpop.eup %3298  ;;  %3318 = vrcp.f32 %v2060_v60  ;;  %v2061_v59 = vadd.f32 1.0, %v3297_v56  ;;  %v2626_v17 = vmul.f32 -1.442695, %v1448_v25  ;;  %v1454_v3 = vadd.f32 %v4326_v42, %v4425_v61 }
 0x3bf   : > { %v3301_v8 = vpop.eup %3300  ;;  %3320 = vrcp.f32 %v2059_v19  ;;  %v1957_v53 = vadd.f32 1.0, %v3299_v57  ;;  %v2627_v33 = vmul.f32 -1.442695, %v1558_v21  ;;  %v1571_v19 = vadd.f32 %v4328_v51, %v4478_v4 }
 0x3c0   : > { %v3303_v40 = vpop.eup %3302  ;;  %2380 = vst [vmem:[%s4150_s19 + $0x2d8] sm:$0xff] %v3301_v8  ;;  %3322 = vrcp.f32 %v2061_v59  ;;  %v2632_v41 = vmul.f32 -1.442695, %v1452_v22  ;;  %v1456_v57 = vadd.f32 %v4330_v11, %v4380_v30  ;;  %v2662_v42 = vmul.f32 -1.442695, %v1579_v43 }
 0x3c1   : > { %v3305_v23 = vpop.eup %3304  ;;  %2382 = vst [vmem:[%s4150_s19 + $0x2e8] sm:$0xff] %v3303_v40  ;;  %3324 = vrcp.f32 %v1957_v53  ;;  %v2633_v51 = vmul.f32 -1.442695, %v1454_v3  ;;  %v2648_v53 = vmul.f32 -1.442695, %v1571_v19 }
 0x3c2   : > { %v3307_v35 = vpop.eup %3306  ;;  %2381 = vst [vmem:[%s4150_s19 + $0x2e0] sm:$0xff] %v3305_v23  ;;  %3326 = vpow2.f32 %v2634_v28  ;;  %v1582_v28 = vadd.f32 %v4332_v49, %v4478_v4  ;;  %v2639_v11 = vmul.f32 -1.442695, %v1456_v57 }
 0x3c3   : > { %v3309_v60 = vpop.eup %3308  ;;  %2383 = vst [vmem:[%s4150_s19 + $0x2f0] sm:$0xff] %v3307_v35  ;;  %3328 = vpow2.f32 %v2619_v2 }
 0x3c4   : > { %v3311_v56 = vpop.eup %3310  ;;  %2387 = vst [vmem:[%s4150_s19 + $0x310] sm:$0xff] %v3309_v60  ;;  %3330 = vpow2.f32 %v2620_v36  ;;  %v2669_v40 = vmul.f32 -1.442695, %v1582_v28 }
 0x3c5   : > { %v3313_v32 = vpop.eup %3312  ;;  %2389 = vst [vmem:[%s4150_s19 + $0x320] sm:$0xff] %v3311_v56  ;;  %3332 = vpow2.f32 %v2625_v6 }
 0x3c6   : > { %v3315_v59 = vpop.eup %3314  ;;  %2388 = vst [vmem:[%s4150_s19 + $0x318] sm:$0xff] %v3313_v32  ;;  %3334 = vpow2.f32 %v2641_v15 }
 0x3c7   : > { %v3317_v48 = vpop.eup %3316  ;;  %2390 = vst [vmem:[%s4150_s19 + $0x328] sm:$0xff] %v3315_v59  ;;  %3336 = vpow2.f32 %v2626_v17  ;;  %v1458_v59 = vadd.f32 %v4334_v55, %v4425_v61 }
 0x3c8   : > { %v3319_v8 = vpop.eup %3318  ;;  %2394 = vst [vmem:[%s4150_s19 + $0x348] sm:$0xff] %v3317_v48  ;;  %3338 = vpow2.f32 %v2627_v33  ;;  %v1574_v48 = vadd.f32 %v4336_v13, %v4478_v4  ;;  %v1464_v13 = vadd.f32 %v4346_v16, %v4425_v61 }
 0x3c9   : > { %v3321_v2 = vpop.eup %3320  ;;  %2396 = vst [vmem:[%s4150_s19 + $0x358] sm:$0xff] %v3319_v8  ;;  %3340 = vpow2.f32 %v2632_v41 }
 0x3ca   : > { %v3323_v25 = vpop.eup %3322  ;;  %2395 = vst [vmem:[%s4150_s19 + $0x350] sm:$0xff] %v3321_v2  ;;  %3342 = vpow2.f32 %v2662_v42 }
 0x3cb   : > { %v3325_v36 = vpop.eup %3324  ;;  %2397 = vst [vmem:[%s4150_s19 + $0x360] sm:$0xff] %v3323_v25  ;;  %3344 = vpow2.f32 %v2633_v51  ;;  %v1595_v25 = vadd.f32 %v4344_v39, %v4478_v4 }
 0x3cc   : > { %v3327_v49 = vpop.eup %3326  ;;  %2293 = vst [vmem:[%s4150_s19 + $0x20] sm:$0xff] %v3325_v36  ;;  %3346 = vpow2.f32 %v2648_v53  ;;  %v1462_v53 = vadd.f32 %v4340_v1, %v4380_v30  ;;  %v2640_v36 = vmul.f32 -1.442695, %v1458_v59  ;;  %v2655_v1 = vmul.f32 -1.442695, %v1574_v48 }
 0x3cd   : > { %v3329_v21 = vpop.eup %3328  ;;  %v1973_v23 = vadd.f32 1.0, %v3327_v49  ;;  %3348 = vpow2.f32 %v2639_v11  ;;  %v2690_v16 = vmul.f32 -1.442695, %v1595_v25 }
 0x3ce   : > { %v3331_v6 = vpop.eup %3330  ;;  %v1958_v22 = vadd.f32 1.0, %v3329_v21  ;;  %3350 = vpow2.f32 %v2669_v40  ;;  %v2646_v39 = vmul.f32 -1.442695, %v1462_v53 }
 0x3cf   : > { %v3333_v35 = vpop.eup %3332  ;;  %3352 = vrcp.f32 %v1973_v23  ;;  %v1959_v15 = vadd.f32 1.0, %v3331_v6  ;;  %v1587_v23 = vadd.f32 %v4350_v47, %v4478_v4  ;;  %v2647_v47 = vmul.f32 -1.442695, %v1464_v13 }
 0x3d0   : > { %v3335_v43 = vpop.eup %3334  ;;  %3354 = vrcp.f32 %v1958_v22  ;;  %v1964_v60 = vadd.f32 1.0, %v3333_v35  ;;  %v1466_v22 = vadd.f32 %v4352_v34, %v4380_v30 }
 0x3d1   : > { %v3337_v17 = vpop.eup %3336  ;;  %3356 = vrcp.f32 %v1959_v15  ;;  %v1980_v3 = vadd.f32 1.0, %v3335_v43  ;;  %v1598_v15 = vadd.f32 %v4356_v14, %v4478_v4  ;;  %v2676_v34 = vmul.f32 -1.442695, %v1587_v23 }
 0x3d2   : > { %v3339_v56 = vpop.eup %3338  ;;  %3358 = vrcp.f32 %v1964_v60  ;;  %v1965_v33 = vadd.f32 1.0, %v3337_v17  ;;  %v1468_v60 = vadd.f32 %v4358_v44, %v4425_v61  ;;  %v2653_v14 = vmul.f32 -1.442695, %v1466_v22 }
 0x3d3   : > { %v3341_v19 = vpop.eup %3340  ;;  %3360 = vrcp.f32 %v1980_v3  ;;  %v1966_v32 = vadd.f32 1.0, %v3339_v56  ;;  %v1590_v3 = vadd.f32 %v4362_v58, %v4478_v4  ;;  %v2697_v44 = vmul.f32 -1.442695, %v1598_v15 }
 0x3d4   : > { %v3343_v41 = vpop.eup %3342  ;;  %3362 = vrcp.f32 %v1965_v33  ;;  %v1971_v57 = vadd.f32 1.0, %v3341_v19  ;;  %v1472_v33 = vadd.f32 %v4373_v62, %v4380_v30  ;;  %v2654_v58 = vmul.f32 -1.442695, %v1468_v60 }
 0x3d5   : > { %v3345_v42 = vpop.eup %3344  ;;  %3364 = vrcp.f32 %v1966_v32  ;;  %v2001_v28 = vadd.f32 1.0, %v3343_v41  ;;  %v1611_v32 = vadd.f32 %v4375_v27, %v4478_v4  ;;  %v2683_v62 = vmul.f32 -1.442695, %v1590_v3 }
 0x3d6   : > { %v3347_v51 = vpop.eup %3346  ;;  %3366 = vrcp.f32 %v1971_v57  ;;  %v1972_v8 = vadd.f32 1.0, %v3345_v42  ;;  %v1474_v57 = vadd.f32 %v4382_v31, %v4425_v61  ;;  %v2660_v42 = vmul.f32 -1.442695, %v1472_v33 }
 0x3d7   : > { %v3349_v2 = vpop.eup %3348  ;;  %3368 = vrcp.f32 %v2001_v28  ;;  %v1987_v11 = vadd.f32 1.0, %v3347_v51  ;;  %v2718_v27 = vmul.f32 -1.442695, %v1611_v32 }
 0x3d8   : > { %v3351_v55 = vpop.eup %3350  ;;  %3370 = vrcp.f32 %v1972_v8  ;;  %v1978_v40 = vadd.f32 1.0, %v3349_v2  ;;  %v2661_v51 = vmul.f32 -1.442695, %v1474_v57 }
 0x3d9   : > { %v3353_v49 = vpop.eup %3352  ;;  %3372 = vrcp.f32 %v1987_v11  ;;  %v2008_v21 = vadd.f32 1.0, %v3351_v55 }
 0x3da   : > { %v3355_v6 = vpop.eup %3354  ;;  %2309 = vst [vmem:[%s4150_s19 + $0xa0] sm:$0xff] %v3353_v49  ;;  %3374 = vrcp.f32 %v1978_v40 }
 0x3db   : > { %v3357_v35 = vpop.eup %3356  ;;  %2294 = vst [vmem:[%s4150_s19 + $0x28] sm:$0xff] %v3355_v6  ;;  %3376 = vrcp.f32 %v2008_v21 }
 0x3dc   : > { %v3359_v43 = vpop.eup %3358  ;;  %2295 = vst [vmem:[%s4150_s19 + $0x30] sm:$0xff] %v3357_v35  ;;  %3378 = vpow2.f32 %v2640_v36 }
 0x3dd   : > { %v3361_v17 = vpop.eup %3360  ;;  %2300 = vst [vmem:[%s4150_s19 + $0x58] sm:$0xff] %v3359_v43  ;;  %3380 = vpow2.f32 %v2655_v1 }
 0x3de   : > { %v3363_v56 = vpop.eup %3362  ;;  %2316 = vst [vmem:[%s4150_s19 + $0xd8] sm:$0xff] %v3361_v17  ;;  %3382 = vpow2.f32 %v2646_v39  ;;  %v1614_v17 = vadd.f32 %v4388_v54, %v4478_v4  ;;  %v2667_v54 = vmul.f32 -1.442695, %v4393_v29  ;;  %v1488_v29 = vadd.f32 %v4409_v9, %v4425_v61 }
 0x3df   : > { %v3365_v19 = vpop.eup %3364  ;;  %2301 = vst [vmem:[%s4150_s19 + $0x60] sm:$0xff] %v3363_v56  ;;  %3384 = vpow2.f32 %v2690_v16  ;;  %v1603_v16 = vadd.f32 %v4384_v52, %v4478_v4  ;;  %v1478_v56 = vadd.f32 %v4395_v18, %v4425_v61  ;;  %v1484_v18 = vadd.f32 %v4404_v26, %v4425_v61 }
 0x3e0   : > { %v3367_v41 = vpop.eup %3366  ;;  %2302 = vst [vmem:[%s4150_s19 + $0x68] sm:$0xff] %v3365_v19  ;;  %3386 = vpow2.f32 %v2647_v47  ;;  %v1606_v19 = vadd.f32 %v4397_v45, %v4478_v4 }
 0x3e1   : > { %v3369_v59 = vpop.eup %3368  ;;  %2307 = vst [vmem:[%s4150_s19 + $0x90] sm:$0xff] %v3367_v41  ;;  %3388 = vpow2.f32 %v2676_v34  ;;  %v2704_v33 = vmul.f32 -1.442695, %v1603_v16 }
 0x3e2   : > { %v3371_v30 = vpop.eup %3370  ;;  %2337 = vst [vmem:[%s4150_s19 + $0x180] sm:$0xff] %v3369_v59  ;;  %3390 = vpow2.f32 %v2653_v14  ;;  %v2668_v59 = vmul.f32 -1.442695, %v1478_v56  ;;  %v2711_v4 = vmul.f32 -1.442695, %v1606_v19 }
 0x3e3   : > { %v3373_v28 = vpop.eup %3372  ;;  %2308 = vst [vmem:[%s4150_s19 + $0x98] sm:$0xff] %v3371_v30  ;;  %3392 = vpow2.f32 %v2697_v44  ;;  %v4706_v30 = vld [vmem:[#allocation16_spill] sm:$0xff] }
 0x3e4   : > { %v3375_v48 = vpop.eup %3374  ;;  %2323 = vst [vmem:[%s4150_s19 + $0x110] sm:$0xff] %v3373_v28  ;;  %3394 = vpow2.f32 %v2654_v58  ;;  %v2725_v58 = vmul.f32 -1.442695, %v1614_v17  ;;  %v2675_v28 = vmul.f32 -1.442695, %v1484_v18 }
 0x3e5   : > { %v3377_v8 = vpop.eup %3376  ;;  %2314 = vst [vmem:[%s4150_s19 + $0xc8] sm:$0xff] %v3375_v48  ;;  %3396 = vpow2.f32 %v2683_v62  ;;  %v2709_v18 = vmul.f32 -1.442695, %v4460_v12 }
 0x3e6   : > { %v3379_v31 = vpop.eup %3378  ;;  %2344 = vst [vmem:[%s4150_s19 + $0x1b8] sm:$0xff] %v3377_v8  ;;  %3398 = vpow2.f32 %v2660_v42  ;;  %v2674_v42 = vmul.f32 -1.442695, %v4706_v30 }
 0x3e7   : > { %v3381_v53 = vpop.eup %3380  ;;  %v1979_v2 = vadd.f32 1.0, %v3379_v31  ;;  %3400 = vpow2.f32 %v2718_v27  ;;  %v1494_v27 = vadd.f32 %v4416_v38, %v4425_v61  ;;  %v2682_v31 = vmul.f32 -1.442695, %v1488_v29 }
 0x3e8   : > { %v3383_v11 = vpop.eup %3382  ;;  %v1994_v25 = vadd.f32 1.0, %v3381_v53  ;;  %3402 = vpow2.f32 %v2661_v51  ;;  %v4707_v51 = vld [vmem:[#allocation17_spill] sm:$0xff]  ;;  %v2723_v29 = vmul.f32 -1.442695, %v4481_v50 }
 0x3e9   : > { %v3385_v55 = vpop.eup %3384  ;;  %3404 = vrcp.f32 %v1979_v2  ;;  %v1985_v40 = vadd.f32 1.0, %v3383_v11  ;;  %v2681_v9 = vmul.f32 -1.442695, %v4707_v51  ;;  %v2688_v2 = vmul.f32 -1.442695, %v4414_v63 }
 0x3ea   : > { %v3387_v36 = vpop.eup %3386  ;;  %3406 = vrcp.f32 %v1994_v25  ;;  %v2029_v13 = vadd.f32 1.0, %v3385_v55  ;;  %v2689_v38 = vmul.f32 -1.442695, %v1494_v27  ;;  %v2695_v25 = vmul.f32 -1.442695, %v4430_v37 }
 0x3eb   : > { %v3389_v49 = vpop.eup %3388  ;;  %3408 = vrcp.f32 %v1985_v40  ;;  %v1986_v21 = vadd.f32 1.0, %v3387_v36  ;;  %v2696_v40 = vmul.f32 -1.442695, %v4435_v0 }
 0x3ec   : > { %v3391_v1 = vpop.eup %3390  ;;  %3410 = vrcp.f32 %v2029_v13  ;;  %v2015_v23 = vadd.f32 1.0, %v3389_v49 }
 0x3ed   : > { %v3393_v6 = vpop.eup %3392  ;;  %3412 = vrcp.f32 %v1986_v21  ;;  %v1992_v39 = vadd.f32 1.0, %v3391_v1 }
 0x3ee   : > { %v3395_v22 = vpop.eup %3394  ;;  %3414 = vrcp.f32 %v2015_v23  ;;  %v2036_v35 = vadd.f32 1.0, %v3393_v6 }
 0x3ef   : > { %v3397_v15 = vpop.eup %3396  ;;  %3416 = vrcp.f32 %v1992_v39  ;;  %v1993_v43 = vadd.f32 1.0, %v3395_v22 }
 0x3f0   : > { %v3399_v47 = vpop.eup %3398  ;;  %3418 = vrcp.f32 %v2036_v35  ;;  %v2022_v60 = vadd.f32 1.0, %v3397_v15 }
 0x3f1   : > { %v3401_v34 = vpop.eup %3400  ;;  %3420 = vrcp.f32 %v1993_v43  ;;  %v1999_v3 = vadd.f32 1.0, %v3399_v47 }
 0x3f2   : > { %v3403_v14 = vpop.eup %3402  ;;  %3422 = vrcp.f32 %v2022_v60  ;;  %v2057_v52 = vadd.f32 1.0, %v3401_v34 }
 0x3f3   : > { %v3405_v44 = vpop.eup %3404  ;;  %3424 = vrcp.f32 %v1999_v3  ;;  %v2000_v32 = vadd.f32 1.0, %v3403_v14 }
 0x3f4   : > { %v3407_v41 = vpop.eup %3406  ;;  %2315 = vst [vmem:[%s4150_s19 + $0xd0] sm:$0xff] %v3405_v44  ;;  %3426 = vrcp.f32 %v2057_v52  ;;  %v2702_v44 = vmul.f32 -1.442695, %v4450_v20  ;;  %v2716_v20 = vmul.f32 -1.442695, %v4472_v24 }
 0x3f5   : > { %v3409_v57 = vpop.eup %3408  ;;  %2330 = vst [vmem:[%s4150_s19 + $0x148] sm:$0xff] %v3407_v41  ;;  %3428 = vrcp.f32 %v2000_v32  ;;  %v2703_v41 = vmul.f32 -1.442695, %v4455_v5  ;;  %v2717_v5 = vmul.f32 -1.442695, %v4475_v7 }
 0x3f6   : > { %v3411_v45 = vpop.eup %3410  ;;  %2321 = vst [vmem:[%s4150_s19 + $0x100] sm:$0xff] %v3409_v57  ;;  %3430 = vpow2.f32 %v2704_v33 }
 0x3f7   : > { %v3413_v62 = vpop.eup %3412  ;;  %2365 = vst [vmem:[%s4150_s19 + $0x260] sm:$0xff] %v3411_v45  ;;  %3432 = vpow2.f32 %v2667_v54 }
 0x3f8   : > { %v3415_v26 = vpop.eup %3414  ;;  %2322 = vst [vmem:[%s4150_s19 + $0x108] sm:$0xff] %v3413_v62  ;;  %3434 = vpow2.f32 %v2725_v58  ;;  %v2724_v62 = vmul.f32 -1.442695, %v4484_v10 }
 0x3f9   : > { %v3417_v48 = vpop.eup %3416  ;;  %2351 = vst [vmem:[%s4150_s19 + $0x1f0] sm:$0xff] %v3415_v26  ;;  %3436 = vpow2.f32 %v2668_v59  ;;  %v2710_v59 = vmul.f32 -1.442695, %v4465_v46 }
 0x3fa   : > { %v3419_v8 = vpop.eup %3418  ;;  %2328 = vst [vmem:[%s4150_s19 + $0x138] sm:$0xff] %v3417_v48  ;;  %3438 = vpow2.f32 %v2711_v4 }
 0x3fb   : > { %v3421_v53 = vpop.eup %3420  ;;  %2372 = vst [vmem:[%s4150_s19 + $0x298] sm:$0xff] %v3419_v8  ;;  %3440 = vpow2.f32 %v2674_v42 }
 0x3fc   : > { %v3423_v11 = vpop.eup %3422  ;;  %2329 = vst [vmem:[%s4150_s19 + $0x140] sm:$0xff] %v3421_v53  ;;  %3442 = vpow2.f32 %v2675_v28 }
 0x3fd   : > { %v3425_v61 = vpop.eup %3424  ;;  %2358 = vst [vmem:[%s4150_s19 + $0x228] sm:$0xff] %v3423_v11  ;;  %3444 = vpow2.f32 %v2681_v9 }
 0x3fe   : > { %v3427_v55 = vpop.eup %3426  ;;  %2335 = vst [vmem:[%s4150_s19 + $0x170] sm:$0xff] %v3425_v61  ;;  %3446 = vpow2.f32 %v2682_v31 }
 0x3ff   : > { %v3429_v36 = vpop.eup %3428  ;;  %2393 = vst [vmem:[%s4150_s19 + $0x340] sm:$0xff] %v3427_v55  ;;  %3448 = vpow2.f32 %v2688_v2 }
 0x400   : > { %v3431_v13 = vpop.eup %3430  ;;  %2336 = vst [vmem:[%s4150_s19 + $0x178] sm:$0xff] %v3429_v36  ;;  %3450 = vpow2.f32 %v2689_v38 }
 0x401   : > { %v3433_v63 = vpop.eup %3432  ;;  %v2043_v49 = vadd.f32 1.0, %v3431_v13  ;;  %3452 = vpow2.f32 %v2695_v25 }
 0x402   : > { %v3435_v21 = vpop.eup %3434  ;;  %v2006_v1 = vadd.f32 1.0, %v3433_v63  ;;  %3454 = vpow2.f32 %v2696_v40 }
 0x403   : > { %v3437_v23 = vpop.eup %3436  ;;  %3456 = vrcp.f32 %v2043_v49  ;;  %v2064_v37 = vadd.f32 1.0, %v3435_v21 }
 0x404   : > { %v3439_v6 = vpop.eup %3438  ;;  %3458 = vrcp.f32 %v2006_v1  ;;  %v2007_v39 = vadd.f32 1.0, %v3437_v23 }
 0x405   : > { %v3441_v22 = vpop.eup %3440  ;;  %3460 = vrcp.f32 %v2064_v37  ;;  %v2050_v0 = vadd.f32 1.0, %v3439_v6 }
 0x406   : > { %v3443_v35 = vpop.eup %3442  ;;  %3462 = vrcp.f32 %v2007_v39  ;;  %v2013_v16 = vadd.f32 1.0, %v3441_v22 }
 0x407   : > { %v3445_v15 = vpop.eup %3444  ;;  %3464 = vrcp.f32 %v2050_v0  ;;  %v2014_v43 = vadd.f32 1.0, %v3443_v35 }
 0x408   : > { %v3447_v47 = vpop.eup %3446  ;;  %3466 = vrcp.f32 %v2013_v16  ;;  %v2020_v60 = vadd.f32 1.0, %v3445_v15 }
 0x409   : > { %v3449_v17 = vpop.eup %3448  ;;  %3468 = vrcp.f32 %v2014_v43  ;;  %v2021_v34 = vadd.f32 1.0, %v3447_v47 }
 0x40a   : > { %v3451_v3 = vpop.eup %3450  ;;  %3470 = vrcp.f32 %v2020_v60  ;;  %v2027_v56 = vadd.f32 1.0, %v3449_v17 }
 0x40b   : > { %v3453_v14 = vpop.eup %3452  ;;  %3472 = vrcp.f32 %v2021_v34  ;;  %v2028_v52 = vadd.f32 1.0, %v3451_v3 }
 0x40c   : > { %v3455_v33 = vpop.eup %3454  ;;  %3474 = vrcp.f32 %v2027_v56  ;;  %v2034_v19 = vadd.f32 1.0, %v3453_v14 }
 0x40d   : > { %v3457_v32 = vpop.eup %3456  ;;  %3476 = vrcp.f32 %v2028_v52  ;;  %v2035_v54 = vadd.f32 1.0, %v3455_v33 }
 0x40e   : > { %v3459_v58 = vpop.eup %3458  ;;  %2379 = vst [vmem:[%s4150_s19 + $0x2d0] sm:$0xff] %v3457_v32  ;;  %3478 = vrcp.f32 %v2034_v19 }
 0x40f   : > { %v3461_v57 = vpop.eup %3460  ;;  %2342 = vst [vmem:[%s4150_s19 + $0x1a8] sm:$0xff] %v3459_v58  ;;  %3480 = vrcp.f32 %v2035_v54 }
 0x410   : > { %v3463_v45 = vpop.eup %3462  ;;  %2400 = vst [vmem:[%s4150_s19 + $0x378] sm:$0xff] %v3461_v57  ;;  %3482 = vpow2.f32 %v2702_v44 }
 0x411   : > { %v3465_v4 = vpop.eup %3464  ;;  %2343 = vst [vmem:[%s4150_s19 + $0x1b0] sm:$0xff] %v3463_v45  ;;  %3484 = vpow2.f32 %v2703_v41 }
 0x412   : > { %v3467_v12 = vpop.eup %3466  ;;  %2386 = vst [vmem:[%s4150_s19 + $0x308] sm:$0xff] %v3465_v4  ;;  %3486 = vpow2.f32 %v2709_v18 }
 0x413   : > { %v3469_v46 = vpop.eup %3468  ;;  %2349 = vst [vmem:[%s4150_s19 + $0x1e0] sm:$0xff] %v3467_v12  ;;  %3488 = vpow2.f32 %v2710_v59 }
 0x414   : > { %v3471_v24 = vpop.eup %3470  ;;  %2350 = vst [vmem:[%s4150_s19 + $0x1e8] sm:$0xff] %v3469_v46  ;;  %3490 = vpow2.f32 %v2716_v20 }
 0x415   : > { %v3473_v30 = vpop.eup %3472  ;;  %2356 = vst [vmem:[%s4150_s19 + $0x218] sm:$0xff] %v3471_v24  ;;  %3492 = vpow2.f32 %v2717_v5 }
 0x416   : > { %v3475_v7 = vpop.eup %3474  ;;  %2357 = vst [vmem:[%s4150_s19 + $0x220] sm:$0xff] %v3473_v30  ;;  %3494 = vpow2.f32 %v2723_v29 }
 0x417   : > { %v3477_v42 = vpop.eup %3476  ;;  %2363 = vst [vmem:[%s4150_s19 + $0x250] sm:$0xff] %v3475_v7  ;;  %3496 = vpow2.f32 %v2724_v62 }
 0x418   : > { %v3479_v50 = vpop.eup %3478  ;;  %2364 = vst [vmem:[%s4150_s19 + $0x258] sm:$0xff] %v3477_v42 }
 0x419   : > { %v3481_v26 = vpop.eup %3480  ;;  %2370 = vst [vmem:[%s4150_s19 + $0x288] sm:$0xff] %v3479_v50 }
 0x41a   : > { %v3483_v28 = vpop.eup %3482  ;;  %2371 = vst [vmem:[%s4150_s19 + $0x290] sm:$0xff] %v3481_v26 }
 0x41b   : > { %v3485_v10 = vpop.eup %3484  ;;  %v2041_v27 = vadd.f32 1.0, %v3483_v28 }
 0x41c   : > { %v3487_v48 = vpop.eup %3486  ;;  %v2042_v51 = vadd.f32 1.0, %v3485_v10 }
 0x41d   : > { %v3489_v9 = vpop.eup %3488  ;;  %3498 = vrcp.f32 %v2041_v27  ;;  %v2048_v8 = vadd.f32 1.0, %v3487_v48 }
 0x41e   : > { %v3491_v31 = vpop.eup %3490  ;;  %3500 = vrcp.f32 %v2042_v51  ;;  %v2049_v53 = vadd.f32 1.0, %v3489_v9 }
 0x41f   : > { %v3493_v2 = vpop.eup %3492  ;;  %3502 = vrcp.f32 %v2048_v8  ;;  %v2055_v11 = vadd.f32 1.0, %v3491_v31 }
 0x420   : > { %v3495_v38 = vpop.eup %3494  ;;  %3504 = vrcp.f32 %v2049_v53  ;;  %v2056_v61 = vadd.f32 1.0, %v3493_v2 }
 0x421   : > { %v3497_v25 = vpop.eup %3496  ;;  %3506 = vrcp.f32 %v2055_v11  ;;  %v2062_v55 = vadd.f32 1.0, %v3495_v38 }
 0x422   : > { %3508 = vrcp.f32 %v2056_v61  ;;  %v2063_v40 = vadd.f32 1.0, %v3497_v25 }
 0x423   : > { %3510 = vrcp.f32 %v2062_v55 }
 0x424   : > { %3512 = vrcp.f32 %v2063_v40 }
 0x427   : > { %v3499_v36 = vpop.eup %3498 }
 0x428   : > { %v3501_v13 = vpop.eup %3500  ;;  %2377 = vst [vmem:[%s4150_s19 + $0x2c0] sm:$0xff] %v3499_v36 }
 0x429   : > { %v3503_v63 = vpop.eup %3502  ;;  %2378 = vst [vmem:[%s4150_s19 + $0x2c8] sm:$0xff] %v3501_v13 }
 0x42a   : > { %v3505_v49 = vpop.eup %3504  ;;  %2384 = vst [vmem:[%s4150_s19 + $0x2f8] sm:$0xff] %v3503_v63 }
 0x42b   : > { %v3507_v21 = vpop.eup %3506  ;;  %2385 = vst [vmem:[%s4150_s19 + $0x300] sm:$0xff] %v3505_v49 }
 0x42c   : > { %v3509_v1 = vpop.eup %3508  ;;  %2391 = vst [vmem:[%s4150_s19 + $0x330] sm:$0xff] %v3507_v21 }
 0x42d   : > { %v3511_v23 = vpop.eup %3510  ;;  %2392 = vst [vmem:[%s4150_s19 + $0x338] sm:$0xff] %v3509_v1 }
 0x42e   : > { %v3513_v37 = vpop.eup %3512  ;;  %2398 = vst [vmem:[%s4150_s19 + $0x368] sm:$0xff] %v3511_v23 }
 0x42f   : > { %2399 = vst [vmem:[%s4150_s19 + $0x370] sm:$0xff] %v3513_v37 }
 0x430   : > { %3642 = shalt.err (!%p3639_p4)
}
 0x431   : > { %s3643_s8 = scalar_lea.hbm %s4628_s30, 14336  ;;  %s3647_s29 = scalar_lea.hbm %s4684_s7, 28672 }
 0x432   : > { %p3644_p9 = scmp.ne.s32.totalorder %s4628_s30, %s3643_s8  ;;  %p3648_p8 = scmp.lt.u32.totalorder %s4628_s30, %s4684_s7 }
 0x433   : > { %p3649_p13 = scmp.lt.u32.totalorder %s3647_s29, %s3643_s8  ;;  %p3651_p10 = scmp.lt.u32.totalorder %s3643_s8, %s4628_s30 }
 0x434   : > { %p3645_p0 = pnand %p3644_p9, %p3908_p5 }
 0x435   : > { %p3650_p6 = por %p3649_p13, %p3648_p8 }
 0x436   : > { %p3646_p11 = pneg %p3645_p0 }
 0x437   : > { %p3652_p3 = por %p3651_p10, %p3650_p6 }
 0x439   : > { %p3653_p7 = pnand %p3652_p3, %p3646_p11 }
 0x43b   : > { %3656 = shalt.err (!%p3653_p7)
}
 0x43c   : > { %s3715_s22 = smov 896   ;;  %s3716_s12 = smov 56  }
 0x43d   : > { %2892 = dma.vmem_to_hbm [thread:$0]  (%p3908_p5), %s4631_s10, 14336, %s4628_s30, %s2402_s28, %s3715_s22, %s3715_s22, %s3716_s12  }
 0x43e PF: > { %s4708_s9 = sld [smem:[#allocation15_spill]]  ;;  %s2431_s13 = sand.u32 1, %s3691_s24  }
 0x43f   : > { %p4710_p1 = scmp.ge.s32.totalorder %s3703_s27, 2  ;;  %s2432_s15 = scalar_lea.sflag [#allocation4], %s2431_s13 }
 0x444   : > { %p4709_p12 = scmp.ne.s32.totalorder %s4708_s9, 0 }
 0x446   : > { %p2909_p2 = pnand %p4710_p1, %p4709_p12 }
 0x448   : > { %3686 = dma.done.wait (!%p2909_p2), %s2432_s15, 14336  }
 0x449   : > { %3688 = vsyncadd (!%p2909_p2), %s2432_s15, 4294952960  ;;  %p22_p4 = scmp.ge.s32.totalorder %s3894_s18, 4   ;;  %s4711_s24 = smov %s3695_s25 }
 0x44a   : > { %s4712_s25 = smov %s3699_s26  ;;  %s4713_s26 = smov %s3904_s21 }
 0x44b   : > { %s4714_s27 = smov %s3894_s18  ;;  %24 = sbr.rel (!%p22_p4) target bundleno = 7 (0x7), region = 105 }
 0x452   :  { %2437 = vsyncpa [#allocation3], 1 }
 0x453   :  { %2439 = vsyncpa [#allocation3 + $0x1], 1 }
 0x454   :  { %2440 = vsyncpa [#allocation6], 1 }
 0x455   :  { %2441 = vsyncpa [#allocation9], 1 }
 0x456   :  { %2442 = vsyncpa [#allocation4], 1 }
 0x457   :  { %2444 = vsyncpa [#allocation4 + $0x1], 1 }

</bundles_post_ra>
